<compile_context>
chip_gen: v6e
topology: v6e:2x2x1
jax: 0.10.0
libtpu: 0.0.40
codegen_flags: <defaults>
</compile_context>

<pallas_src>
import jax
import jax.numpy as jnp
from jax.experimental import pallas as pl
from jax.experimental.pallas import tpu as pltpu

R_COEF = 0.5  # TODO(synk): `args.r` is not defined in the provided module; fixed constant.


# ---------------------------------------------------------------------------
# In-kernel helpers (pure VPU stencils on (TB, H/2, W)-shaped values)
# ---------------------------------------------------------------------------
def _shift_col(z, d, zpad):
    """out[..., j] = z[..., j+d] (zero fill). `zpad` is a hoisted (.., .., |d|) zeros tile."""
    n = z.shape[2]
    if abs(d) >= n:
        return jnp.zeros_like(z)
    if d > 0:
        return jnp.concatenate([z[:, :, d:], zpad], axis=2)
    return jnp.concatenate([zpad, z[:, :, :d]], axis=2)


def _shift_row(z, d, zpad):
    """out[:, r, :] = z[:, r+d, :] (zero fill). `zpad` is a hoisted (.., |d|, ..) zeros tile."""
    n = z.shape[1]
    if abs(d) >= n:
        return jnp.zeros_like(z)
    if d > 0:
        return jnp.concatenate([z[:, d:, :], zpad], axis=1)
    return jnp.concatenate([zpad, z[:, :d, :]], axis=1)


def _lgrad_kernel(a_ref, b_ref, f_ref, out_ref):
    xa = a_ref[...]                    # (TB, H/2, 2W): lanes [0,W)=even rows, [W,2W)=odd rows
    xb = b_ref[...]
    xf = f_ref[...]
    tb, hh, w2 = xa.shape
    w = w2 // 2
    dt = xa.dtype

    # Hoisted zero-pad tiles, shared by every shift below (JAX does not CSE these).
    zc1 = jnp.zeros((tb, hh, 1), dt)
    zc2 = jnp.zeros((tb, hh, 2), dt)
    zr1 = jnp.zeros((tb, 1, w), dt)

    def haar_parts(x):
        """Shared Haar intermediates (unscaled by 1/2; valid at even lanes only)."""
        xe = x[:, :, :w]               # even input rows
        xo = x[:, :, w:]               # odd input rows
        te = _shift_col(xe, 1, zc1)    # xe[., ., j+1]
        to = _shift_col(xo, 1, zc1)
        lo_e = xe + te                 # low-pass along W on even rows
        hi_e = te - xe                 # high-pass along W on even rows
        lo_o = xo + to
        hi_o = to - xo
        return lo_e, lo_o, hi_e, hi_o

    def band(parts, k):
        """2x the haar subband k (0=LL, 1=LH, 2=HL, 3=HH), shape (TB, H/2, W)."""
        lo_e, lo_o, hi_e, hi_o = parts
        if k == 0:
            return lo_e + lo_o         # LL
        if k == 1:
            return hi_e + hi_o         # LH
        if k == 2:
            return lo_o - lo_e         # HL
        return hi_o - hi_e             # HH

    def sobel(z):
        """|sobel_x| + |sobel_y| (3x3, zero pad) on a column-interleaved subband."""
        zu = _shift_row(z, -1, zr1)    # subband row r-1 (zero at top)
        zd = _shift_row(z, 1, zr1)     # subband row r+1 (zero at bottom)
        t1 = zu + 2.0 * z + zd         # [1,2,1] over rows
        sx = _shift_col(t1, 2, zc2) - _shift_col(t1, -2, zc2)             # [-1,0,1] cols
        t2 = zu - zd                   # [1,0,-1] over rows
        sy = _shift_col(t2, -2, zc2) + 2.0 * t2 + _shift_col(t2, 2, zc2)  # [1,2,1] cols
        return jnp.abs(sx) + jnp.abs(sy)

    pa = haar_parts(xa)
    pb = haar_parts(xb)
    pf = haar_parts(xf)

    for k in range(4):                 # LL, LH, HL, HH
        grad = jnp.maximum(sobel(band(pa, k)), sobel(band(pb, k)))
        diff = jnp.abs(band(pf, k) - grad)
        # Per-lane partial sum over batch + rows; odd (garbage) lanes are dropped
        # and the deferred 1/2 haar scale is applied outside the kernel.
        part = jnp.sum(jnp.sum(diff, axis=0), axis=0, keepdims=True)      # (1, W)
        out_ref[pl.ds(k, 1), :] = part


# ---------------------------------------------------------------------------
# Wrapper
# ---------------------------------------------------------------------------
def _pick_block_batch(batch, h, w, budget_bytes=24 << 20, live_factor=16):
    """Largest divisor of `batch` keeping estimated live VMEM under budget.

    live_factor ~ 3 inputs x 2 pipeline buffers + ~10 half-plane stencil/band
    temporaries, all counted per f32 plane of h*w elements.
    """
    psz = h * w * 4
    cap = max(1, budget_bytes // (live_factor * psz))
    divs = [d for d in range(1, batch + 1) if batch % d == 0 and d <= cap]
    tb = max(divs) if divs else 1
    # Keep the parallel grid >= 2 steps when possible (v7x has 2 TensorCores).
    if batch // tb < 2:
        smaller = [d for d in divs if batch // d >= 2]
        if smaller:
            tb = max(smaller)
    return tb


def l_grad_loss(image_A, image_B, image_fused, r=R_COEF):
    N, C, H, W = image_A.shape
    assert H % 2 == 0 and W % 2 == 0, "haar DWT requires even H and W"
    Bt = N * C
    hh = H // 2

    # Row-pair fold: (Bt, H, W) -> (Bt, H/2, 2W). Free row-major reshape:
    # lanes [0, W) hold row 2r, lanes [W, 2W) hold row 2r+1.
    a = image_A.astype(jnp.float32).reshape(Bt, hh, 2 * W)
    b = image_B.astype(jnp.float32).reshape(Bt, hh, 2 * W)
    f = image_fused.astype(jnp.float32).reshape(Bt, hh, 2 * W)

    TB = _pick_block_batch(Bt, H, W)
    G = Bt // TB
    # TODO(synk): very large single planes (H*W*4 >> few MiB) additionally need
    # spatial tiling with 1-pixel halos; not required at the spec'd scale.

    img_spec = pl.BlockSpec((TB, hh, 2 * W), lambda i: (i, 0, 0))
    out = pl.pallas_call(
        _lgrad_kernel,
        out_shape=jax.ShapeDtypeStruct((G, 4, W), jnp.float32),
        grid=(G,),
        in_specs=[img_spec, img_spec, img_spec],
        out_specs=pl.BlockSpec((None, 4, W), lambda i: (i, 0, 0)),
        compiler_params=pltpu.CompilerParams(
            dimension_semantics=("parallel",),
            vmem_limit_bytes=32 * 1024 * 1024,
        ),
    )(a, b, f)

    # Even lanes hold the valid subband columns; odd lanes are garbage partials.
    band_sums = jnp.sum(jnp.sum(out, axis=0)[:, 0::2], axis=1)        # (4,)
    # Kernel bands/diffs carry a deferred 2x haar scale -> extra factor 2 here.
    denom = 2.0 * Bt * (H // 2) * (W // 2)
    means = band_sums / denom                                          # per-band L1 means
    loss = (r * r * means[0] + r * (1 - r) * means[1]
            + r * (1 - r) * means[2] + (1 - r) * (1 - r) * means[3])
    return loss


# ---------------------------------------------------------------------------
# Pure-JAX reference (independent path: strided slicing + padded conv sums)
# ---------------------------------------------------------------------------
def _ref_loss(image_A, image_B, image_fused, r=R_COEF):
    def dwt(x):
        x00 = x[:, 0::2, 0::2]; x01 = x[:, 0::2, 1::2]
        x10 = x[:, 1::2, 0::2]; x11 = x[:, 1::2, 1::2]
        ll = 0.5 * (x00 + x01 + x10 + x11)
        lh = 0.5 * (-x00 + x01 - x10 + x11)
        hl = 0.5 * (-x00 - x01 + x10 + x11)
        hh = 0.5 * (x00 - x01 - x10 + x11)
        return ll, lh, hl, hh

    def sobel(x):
        xp = jnp.pad(x, ((0, 0), (1, 1), (1, 1)))
        sx = (-xp[:, :-2, :-2] + xp[:, :-2, 2:]
              - 2 * xp[:, 1:-1, :-2] + 2 * xp[:, 1:-1, 2:]
              - xp[:, 2:, :-2] + xp[:, 2:, 2:])
        sy = (xp[:, :-2, :-2] + 2 * xp[:, :-2, 1:-1] + xp[:, :-2, 2:]
              - xp[:, 2:, :-2] - 2 * xp[:, 2:, 1:-1] - xp[:, 2:, 2:])
        return jnp.abs(sx) + jnp.abs(sy)

    N, C, H, W = image_A.shape
    a = image_A.reshape(N * C, H, W).astype(jnp.float32)
    b = image_B.reshape(N * C, H, W).astype(jnp.float32)
    f = image_fused.reshape(N * C, H, W).astype(jnp.float32)
    ba, bb, bf = dwt(a), dwt(b), dwt(f)
    weights = [r * r, r * (1 - r), r * (1 - r), (1 - r) * (1 - r)]
    loss = 0.0
    for k in range(4):
        grad = jnp.maximum(sobel(ba[k]), sobel(bb[k]))
        loss = loss + weights[k] * jnp.mean(jnp.abs(bf[k] - grad))
    return loss


if __name__ == "__main__":
    key = jax.random.PRNGKey(0)
    k1, k2, k3 = jax.random.split(key, 3)
    N, C, H, W = 2, 4, 16, 16
    image_A = jax.random.uniform(k1, (N, C, H, W), dtype=jnp.float32)
    image_B = jax.random.uniform(k2, (N, C, H, W), dtype=jnp.float32)
    image_F = jax.random.uniform(k3, (N, C, H, W), dtype=jnp.float32)

    loss = jax.block_until_ready(l_grad_loss(image_A, image_B, image_F))
    ref = jax.block_until_ready(_ref_loss(image_A, image_B, image_F))

    if abs(float(loss) - float(ref)) > 1e-4 * max(1.0, abs(float(ref))):
        raise AssertionError(f"mismatch: pallas={float(loss)} ref={float(ref)}")
    print("KERNEL_OK")
</pallas_src>

<mosaic_0001>
module attributes {stable_mosaic.version = 11 : i64} {
  func.func @_lgrad_kernel(%arg0: i32, %arg1: memref<4x8x32xf32, #tpu.memory_space<vmem>>, %arg2: memref<4x8x32xf32, #tpu.memory_space<vmem>>, %arg3: memref<4x8x32xf32, #tpu.memory_space<vmem>>, %arg4: memref<1x4x16xf32, #tpu.memory_space<vmem>>) attributes {dimension_semantics = [#tpu.dimension_semantics<parallel>], iteration_bounds = array<i64: 2>, scalar_prefetch = 0 : i64, scratch_operands = 0 : i64, tpu.core_type = #tpu.core_type<tc>, window_params = [{transform_indices = @transform_0, window_bounds = array<i64: 4, 8, 32>}, {transform_indices = @transform_1, window_bounds = array<i64: 4, 8, 32>}, {transform_indices = @transform_2, window_bounds = array<i64: 4, 8, 32>}, {transform_indices = @transform_3, window_bounds = array<i64: 1, 4, 16>}]} {
    %c0 = arith.constant 0 : index
    %c0_0 = arith.constant 0 : index
    %c0_1 = arith.constant 0 : index
    %0 = vector.load %arg1[%c0, %c0_0, %c0_1] : memref<4x8x32xf32, #tpu.memory_space<vmem>>, vector<4x8x32xf32>
    %c0_2 = arith.constant 0 : index
    %c0_3 = arith.constant 0 : index
    %c0_4 = arith.constant 0 : index
    %1 = vector.load %arg2[%c0_2, %c0_3, %c0_4] : memref<4x8x32xf32, #tpu.memory_space<vmem>>, vector<4x8x32xf32>
    %c0_5 = arith.constant 0 : index
    %c0_6 = arith.constant 0 : index
    %c0_7 = arith.constant 0 : index
    %2 = vector.load %arg3[%c0_5, %c0_6, %c0_7] : memref<4x8x32xf32, #tpu.memory_space<vmem>>, vector<4x8x32xf32>
    %cst = arith.constant 0.000000e+00 : f32
    %3 = vector.broadcast %cst : f32 to vector<4x8x1xf32>
    %cst_8 = arith.constant 0.000000e+00 : f32
    %4 = vector.broadcast %cst_8 : f32 to vector<4x8x2xf32>
    %cst_9 = arith.constant 0.000000e+00 : f32
    %5 = vector.broadcast %cst_9 : f32 to vector<4x1x16xf32>
    %6 = vector.extract_strided_slice %0 {offsets = [0, 0, 0], sizes = [4, 8, 16], strides = [1, 1, 1]} : vector<4x8x32xf32> to vector<4x8x16xf32>
    %7 = vector.extract_strided_slice %0 {offsets = [0, 0, 16], sizes = [4, 8, 16], strides = [1, 1, 1]} : vector<4x8x32xf32> to vector<4x8x16xf32>
    %8 = vector.extract_strided_slice %6 {offsets = [0, 0, 1], sizes = [4, 8, 15], strides = [1, 1, 1]} : vector<4x8x16xf32> to vector<4x8x15xf32>
    %9 = tpu.concatenate %8, %3 in 2 : vector<4x8x15xf32>, vector<4x8x1xf32> -> vector<4x8x16xf32>
    %10 = vector.extract_strided_slice %7 {offsets = [0, 0, 1], sizes = [4, 8, 15], strides = [1, 1, 1]} : vector<4x8x16xf32> to vector<4x8x15xf32>
    %11 = tpu.concatenate %10, %3 in 2 : vector<4x8x15xf32>, vector<4x8x1xf32> -> vector<4x8x16xf32>
    %12 = arith.addf %6, %9 : vector<4x8x16xf32>
    %13 = arith.subf %9, %6 : vector<4x8x16xf32>
    %14 = arith.addf %7, %11 : vector<4x8x16xf32>
    %15 = arith.subf %11, %7 : vector<4x8x16xf32>
    %16 = vector.extract_strided_slice %1 {offsets = [0, 0, 0], sizes = [4, 8, 16], strides = [1, 1, 1]} : vector<4x8x32xf32> to vector<4x8x16xf32>
    %17 = vector.extract_strided_slice %1 {offsets = [0, 0, 16], sizes = [4, 8, 16], strides = [1, 1, 1]} : vector<4x8x32xf32> to vector<4x8x16xf32>
    %18 = vector.extract_strided_slice %16 {offsets = [0, 0, 1], sizes = [4, 8, 15], strides = [1, 1, 1]} : vector<4x8x16xf32> to vector<4x8x15xf32>
    %19 = tpu.concatenate %18, %3 in 2 : vector<4x8x15xf32>, vector<4x8x1xf32> -> vector<4x8x16xf32>
    %20 = vector.extract_strided_slice %17 {offsets = [0, 0, 1], sizes = [4, 8, 15], strides = [1, 1, 1]} : vector<4x8x16xf32> to vector<4x8x15xf32>
    %21 = tpu.concatenate %20, %3 in 2 : vector<4x8x15xf32>, vector<4x8x1xf32> -> vector<4x8x16xf32>
    %22 = arith.addf %16, %19 : vector<4x8x16xf32>
    %23 = arith.subf %19, %16 : vector<4x8x16xf32>
    %24 = arith.addf %17, %21 : vector<4x8x16xf32>
    %25 = arith.subf %21, %17 : vector<4x8x16xf32>
    %26 = vector.extract_strided_slice %2 {offsets = [0, 0, 0], sizes = [4, 8, 16], strides = [1, 1, 1]} : vector<4x8x32xf32> to vector<4x8x16xf32>
    %27 = vector.extract_strided_slice %2 {offsets = [0, 0, 16], sizes = [4, 8, 16], strides = [1, 1, 1]} : vector<4x8x32xf32> to vector<4x8x16xf32>
    %28 = vector.extract_strided_slice %26 {offsets = [0, 0, 1], sizes = [4, 8, 15], strides = [1, 1, 1]} : vector<4x8x16xf32> to vector<4x8x15xf32>
    %29 = tpu.concatenate %28, %3 in 2 : vector<4x8x15xf32>, vector<4x8x1xf32> -> vector<4x8x16xf32>
    %30 = vector.extract_strided_slice %27 {offsets = [0, 0, 1], sizes = [4, 8, 15], strides = [1, 1, 1]} : vector<4x8x16xf32> to vector<4x8x15xf32>
    %31 = tpu.concatenate %30, %3 in 2 : vector<4x8x15xf32>, vector<4x8x1xf32> -> vector<4x8x16xf32>
    %32 = arith.addf %26, %29 : vector<4x8x16xf32>
    %33 = arith.subf %29, %26 : vector<4x8x16xf32>
    %34 = arith.addf %27, %31 : vector<4x8x16xf32>
    %35 = arith.subf %31, %27 : vector<4x8x16xf32>
    %36 = arith.addf %12, %14 : vector<4x8x16xf32>
    %37 = vector.extract_strided_slice %36 {offsets = [0, 0, 0], sizes = [4, 7, 16], strides = [1, 1, 1]} : vector<4x8x16xf32> to vector<4x7x16xf32>
    %38 = tpu.concatenate %5, %37 in 1 : vector<4x1x16xf32>, vector<4x7x16xf32> -> vector<4x8x16xf32>
    %39 = vector.extract_strided_slice %36 {offsets = [0, 1, 0], sizes = [4, 7, 16], strides = [1, 1, 1]} : vector<4x8x16xf32> to vector<4x7x16xf32>
    %40 = tpu.concatenate %39, %5 in 1 : vector<4x7x16xf32>, vector<4x1x16xf32> -> vector<4x8x16xf32>
    %cst_10 = arith.constant 2.000000e+00 : f32
    %41 = vector.broadcast %cst_10 : f32 to vector<4x8x16xf32>
    %42 = arith.mulf %41, %36 : vector<4x8x16xf32>
    %43 = arith.addf %38, %42 : vector<4x8x16xf32>
    %44 = arith.addf %43, %40 : vector<4x8x16xf32>
    %45 = vector.extract_strided_slice %44 {offsets = [0, 0, 2], sizes = [4, 8, 14], strides = [1, 1, 1]} : vector<4x8x16xf32> to vector<4x8x14xf32>
    %46 = tpu.concatenate %45, %4 in 2 : vector<4x8x14xf32>, vector<4x8x2xf32> -> vector<4x8x16xf32>
    %47 = vector.extract_strided_slice %44 {offsets = [0, 0, 0], sizes = [4, 8, 14], strides = [1, 1, 1]} : vector<4x8x16xf32> to vector<4x8x14xf32>
    %48 = tpu.concatenate %4, %47 in 2 : vector<4x8x2xf32>, vector<4x8x14xf32> -> vector<4x8x16xf32>
    %49 = arith.subf %46, %48 : vector<4x8x16xf32>
    %50 = arith.subf %38, %40 : vector<4x8x16xf32>
    %51 = vector.extract_strided_slice %50 {offsets = [0, 0, 0], sizes = [4, 8, 14], strides = [1, 1, 1]} : vector<4x8x16xf32> to vector<4x8x14xf32>
    %52 = tpu.concatenate %4, %51 in 2 : vector<4x8x2xf32>, vector<4x8x14xf32> -> vector<4x8x16xf32>
    %cst_11 = arith.constant 2.000000e+00 : f32
    %53 = vector.broadcast %cst_11 : f32 to vector<4x8x16xf32>
    %54 = arith.mulf %53, %50 : vector<4x8x16xf32>
    %55 = arith.addf %52, %54 : vector<4x8x16xf32>
    %56 = vector.extract_strided_slice %50 {offsets = [0, 0, 2], sizes = [4, 8, 14], strides = [1, 1, 1]} : vector<4x8x16xf32> to vector<4x8x14xf32>
    %57 = tpu.concatenate %56, %4 in 2 : vector<4x8x14xf32>, vector<4x8x2xf32> -> vector<4x8x16xf32>
    %58 = arith.addf %55, %57 : vector<4x8x16xf32>
    %59 = math.absf %49 : vector<4x8x16xf32>
    %60 = math.absf %58 : vector<4x8x16xf32>
    %61 = arith.addf %59, %60 : vector<4x8x16xf32>
    %62 = arith.addf %22, %24 : vector<4x8x16xf32>
    %63 = vector.extract_strided_slice %62 {offsets = [0, 0, 0], sizes = [4, 7, 16], strides = [1, 1, 1]} : vector<4x8x16xf32> to vector<4x7x16xf32>
    %64 = tpu.concatenate %5, %63 in 1 : vector<4x1x16xf32>, vector<4x7x16xf32> -> vector<4x8x16xf32>
    %65 = vector.extract_strided_slice %62 {offsets = [0, 1, 0], sizes = [4, 7, 16], strides = [1, 1, 1]} : vector<4x8x16xf32> to vector<4x7x16xf32>
    %66 = tpu.concatenate %65, %5 in 1 : vector<4x7x16xf32>, vector<4x1x16xf32> -> vector<4x8x16xf32>
    %cst_12 = arith.constant 2.000000e+00 : f32
    %67 = vector.broadcast %cst_12 : f32 to vector<4x8x16xf32>
    %68 = arith.mulf %67, %62 : vector<4x8x16xf32>
    %69 = arith.addf %64, %68 : vector<4x8x16xf32>
    %70 = arith.addf %69, %66 : vector<4x8x16xf32>
    %71 = vector.extract_strided_slice %70 {offsets = [0, 0, 2], sizes = [4, 8, 14], strides = [1, 1, 1]} : vector<4x8x16xf32> to vector<4x8x14xf32>
    %72 = tpu.concatenate %71, %4 in 2 : vector<4x8x14xf32>, vector<4x8x2xf32> -> vector<4x8x16xf32>
    %73 = vector.extract_strided_slice %70 {offsets = [0, 0, 0], sizes = [4, 8, 14], strides = [1, 1, 1]} : vector<4x8x16xf32> to vector<4x8x14xf32>
    %74 = tpu.concatenate %4, %73 in 2 : vector<4x8x2xf32>, vector<4x8x14xf32> -> vector<4x8x16xf32>
    %75 = arith.subf %72, %74 : vector<4x8x16xf32>
    %76 = arith.subf %64, %66 : vector<4x8x16xf32>
    %77 = vector.extract_strided_slice %76 {offsets = [0, 0, 0], sizes = [4, 8, 14], strides = [1, 1, 1]} : vector<4x8x16xf32> to vector<4x8x14xf32>
    %78 = tpu.concatenate %4, %77 in 2 : vector<4x8x2xf32>, vector<4x8x14xf32> -> vector<4x8x16xf32>
    %cst_13 = arith.constant 2.000000e+00 : f32
    %79 = vector.broadcast %cst_13 : f32 to vector<4x8x16xf32>
    %80 = arith.mulf %79, %76 : vector<4x8x16xf32>
    %81 = arith.addf %78, %80 : vector<4x8x16xf32>
    %82 = vector.extract_strided_slice %76 {offsets = [0, 0, 2], sizes = [4, 8, 14], strides = [1, 1, 1]} : vector<4x8x16xf32> to vector<4x8x14xf32>
    %83 = tpu.concatenate %82, %4 in 2 : vector<4x8x14xf32>, vector<4x8x2xf32> -> vector<4x8x16xf32>
    %84 = arith.addf %81, %83 : vector<4x8x16xf32>
    %85 = math.absf %75 : vector<4x8x16xf32>
    %86 = math.absf %84 : vector<4x8x16xf32>
    %87 = arith.addf %85, %86 : vector<4x8x16xf32>
    %88 = arith.maximumf %61, %87 : vector<4x8x16xf32>
    %89 = arith.addf %32, %34 : vector<4x8x16xf32>
    %90 = arith.subf %89, %88 : vector<4x8x16xf32>
    %91 = math.absf %90 : vector<4x8x16xf32>
    %cst_14 = arith.constant dense<0.000000e+00> : vector<8x16xf32>
    %92 = vector.multi_reduction <add>, %91, %cst_14 [0] : vector<4x8x16xf32> to vector<8x16xf32>
    %cst_15 = arith.constant dense<0.000000e+00> : vector<16xf32>
    %93 = vector.multi_reduction <add>, %92, %cst_15 [0] : vector<8x16xf32> to vector<16xf32>
    %94 = vector.shape_cast %93 : vector<16xf32> to vector<1x16xf32>
    %c0_16 = arith.constant 0 : index
    %c0_17 = arith.constant 0 : index
    %c0_18 = arith.constant 0 : index
    %95 = vector.load %arg4[%c0_16, %c0_17, %c0_18] : memref<1x4x16xf32, #tpu.memory_space<vmem>>, vector<1x1x16xf32>
    %96 = vector.shape_cast %95 : vector<1x1x16xf32> to vector<1x16xf32>
    %97 = vector.shape_cast %94 : vector<1x16xf32> to vector<1x1x16xf32>
    tpu.vector_store %arg4[%c0_16, %c0_17, %c0_18], %97 {strides = array<i32>} : memref<1x4x16xf32, #tpu.memory_space<vmem>>, vector<1x1x16xf32>,
    %98 = arith.addf %13, %15 : vector<4x8x16xf32>
    %99 = vector.extract_strided_slice %98 {offsets = [0, 0, 0], sizes = [4, 7, 16], strides = [1, 1, 1]} : vector<4x8x16xf32> to vector<4x7x16xf32>
    %100 = tpu.concatenate %5, %99 in 1 : vector<4x1x16xf32>, vector<4x7x16xf32> -> vector<4x8x16xf32>
    %101 = vector.extract_strided_slice %98 {offsets = [0, 1, 0], sizes = [4, 7, 16], strides = [1, 1, 1]} : vector<4x8x16xf32> to vector<4x7x16xf32>
    %102 = tpu.concatenate %101, %5 in 1 : vector<4x7x16xf32>, vector<4x1x16xf32> -> vector<4x8x16xf32>
    %cst_19 = arith.constant 2.000000e+00 : f32
    %103 = vector.broadcast %cst_19 : f32 to vector<4x8x16xf32>
    %104 = arith.mulf %103, %98 : vector<4x8x16xf32>
    %105 = arith.addf %100, %104 : vector<4x8x16xf32>
    %106 = arith.addf %105, %102 : vector<4x8x16xf32>
    %107 = vector.extract_strided_slice %106 {offsets = [0, 0, 2], sizes = [4, 8, 14], strides = [1, 1, 1]} : vector<4x8x16xf32> to vector<4x8x14xf32>
    %108 = tpu.concatenate %107, %4 in 2 : vector<4x8x14xf32>, vector<4x8x2xf32> -> vector<4x8x16xf32>
    %109 = vector.extract_strided_slice %106 {offsets = [0, 0, 0], sizes = [4, 8, 14], strides = [1, 1, 1]} : vector<4x8x16xf32> to vector<4x8x14xf32>
    %110 = tpu.concatenate %4, %109 in 2 : vector<4x8x2xf32>, vector<4x8x14xf32> -> vector<4x8x16xf32>
    %111 = arith.subf %108, %110 : vector<4x8x16xf32>
    %112 = arith.subf %100, %102 : vector<4x8x16xf32>
    %113 = vector.extract_strided_slice %112 {offsets = [0, 0, 0], sizes = [4, 8, 14], strides = [1, 1, 1]} : vector<4x8x16xf32> to vector<4x8x14xf32>
    %114 = tpu.concatenate %4, %113 in 2 : vector<4x8x2xf32>, vector<4x8x14xf32> -> vector<4x8x16xf32>
    %cst_20 = arith.constant 2.000000e+00 : f32
    %115 = vector.broadcast %cst_20 : f32 to vector<4x8x16xf32>
    %116 = arith.mulf %115, %112 : vector<4x8x16xf32>
    %117 = arith.addf %114, %116 : vector<4x8x16xf32>
    %118 = vector.extract_strided_slice %112 {offsets = [0, 0, 2], sizes = [4, 8, 14], strides = [1, 1, 1]} : vector<4x8x16xf32> to vector<4x8x14xf32>
    %119 = tpu.concatenate %118, %4 in 2 : vector<4x8x14xf32>, vector<4x8x2xf32> -> vector<4x8x16xf32>
    %120 = arith.addf %117, %119 : vector<4x8x16xf32>
    %121 = math.absf %111 : vector<4x8x16xf32>
    %122 = math.absf %120 : vector<4x8x16xf32>
    %123 = arith.addf %121, %122 : vector<4x8x16xf32>
    %124 = arith.addf %23, %25 : vector<4x8x16xf32>
    %125 = vector.extract_strided_slice %124 {offsets = [0, 0, 0], sizes = [4, 7, 16], strides = [1, 1, 1]} : vector<4x8x16xf32> to vector<4x7x16xf32>
    %126 = tpu.concatenate %5, %125 in 1 : vector<4x1x16xf32>, vector<4x7x16xf32> -> vector<4x8x16xf32>
    %127 = vector.extract_strided_slice %124 {offsets = [0, 1, 0], sizes = [4, 7, 16], strides = [1, 1, 1]} : vector<4x8x16xf32> to vector<4x7x16xf32>
    %128 = tpu.concatenate %127, %5 in 1 : vector<4x7x16xf32>, vector<4x1x16xf32> -> vector<4x8x16xf32>
    %cst_21 = arith.constant 2.000000e+00 : f32
    %129 = vector.broadcast %cst_21 : f32 to vector<4x8x16xf32>
    %130 = arith.mulf %129, %124 : vector<4x8x16xf32>
    %131 = arith.addf %126, %130 : vector<4x8x16xf32>
    %132 = arith.addf %131, %128 : vector<4x8x16xf32>
    %133 = vector.extract_strided_slice %132 {offsets = [0, 0, 2], sizes = [4, 8, 14], strides = [1, 1, 1]} : vector<4x8x16xf32> to vector<4x8x14xf32>
    %134 = tpu.concatenate %133, %4 in 2 : vector<4x8x14xf32>, vector<4x8x2xf32> -> vector<4x8x16xf32>
    %135 = vector.extract_strided_slice %132 {offsets = [0, 0, 0], sizes = [4, 8, 14], strides = [1, 1, 1]} : vector<4x8x16xf32> to vector<4x8x14xf32>
    %136 = tpu.concatenate %4, %135 in 2 : vector<4x8x2xf32>, vector<4x8x14xf32> -> vector<4x8x16xf32>
    %137 = arith.subf %134, %136 : vector<4x8x16xf32>
    %138 = arith.subf %126, %128 : vector<4x8x16xf32>
    %139 = vector.extract_strided_slice %138 {offsets = [0, 0, 0], sizes = [4, 8, 14], strides = [1, 1, 1]} : vector<4x8x16xf32> to vector<4x8x14xf32>
    %140 = tpu.concatenate %4, %139 in 2 : vector<4x8x2xf32>, vector<4x8x14xf32> -> vector<4x8x16xf32>
    %cst_22 = arith.constant 2.000000e+00 : f32
    %141 = vector.broadcast %cst_22 : f32 to vector<4x8x16xf32>
    %142 = arith.mulf %141, %138 : vector<4x8x16xf32>
    %143 = arith.addf %140, %142 : vector<4x8x16xf32>
    %144 = vector.extract_strided_slice %138 {offsets = [0, 0, 2], sizes = [4, 8, 14], strides = [1, 1, 1]} : vector<4x8x16xf32> to vector<4x8x14xf32>
    %145 = tpu.concatenate %144, %4 in 2 : vector<4x8x14xf32>, vector<4x8x2xf32> -> vector<4x8x16xf32>
    %146 = arith.addf %143, %145 : vector<4x8x16xf32>
    %147 = math.absf %137 : vector<4x8x16xf32>
    %148 = math.absf %146 : vector<4x8x16xf32>
    %149 = arith.addf %147, %148 : vector<4x8x16xf32>
    %150 = arith.maximumf %123, %149 : vector<4x8x16xf32>
    %151 = arith.addf %33, %35 : vector<4x8x16xf32>
    %152 = arith.subf %151, %150 : vector<4x8x16xf32>
    %153 = math.absf %152 : vector<4x8x16xf32>
    %cst_23 = arith.constant dense<0.000000e+00> : vector<8x16xf32>
    %154 = vector.multi_reduction <add>, %153, %cst_23 [0] : vector<4x8x16xf32> to vector<8x16xf32>
    %cst_24 = arith.constant dense<0.000000e+00> : vector<16xf32>
    %155 = vector.multi_reduction <add>, %154, %cst_24 [0] : vector<8x16xf32> to vector<16xf32>
    %156 = vector.shape_cast %155 : vector<16xf32> to vector<1x16xf32>
    %c0_25 = arith.constant 0 : index
    %c1 = arith.constant 1 : index
    %c0_26 = arith.constant 0 : index
    %157 = vector.load %arg4[%c0_25, %c1, %c0_26] : memref<1x4x16xf32, #tpu.memory_space<vmem>>, vector<1x1x16xf32>
    %158 = vector.shape_cast %157 : vector<1x1x16xf32> to vector<1x16xf32>
    %159 = vector.shape_cast %156 : vector<1x16xf32> to vector<1x1x16xf32>
    tpu.vector_store %arg4[%c0_25, %c1, %c0_26], %159 {strides = array<i32>} : memref<1x4x16xf32, #tpu.memory_space<vmem>>, vector<1x1x16xf32>,
    %160 = arith.subf %14, %12 : vector<4x8x16xf32>
    %161 = vector.extract_strided_slice %160 {offsets = [0, 0, 0], sizes = [4, 7, 16], strides = [1, 1, 1]} : vector<4x8x16xf32> to vector<4x7x16xf32>
    %162 = tpu.concatenate %5, %161 in 1 : vector<4x1x16xf32>, vector<4x7x16xf32> -> vector<4x8x16xf32>
    %163 = vector.extract_strided_slice %160 {offsets = [0, 1, 0], sizes = [4, 7, 16], strides = [1, 1, 1]} : vector<4x8x16xf32> to vector<4x7x16xf32>
    %164 = tpu.concatenate %163, %5 in 1 : vector<4x7x16xf32>, vector<4x1x16xf32> -> vector<4x8x16xf32>
    %cst_27 = arith.constant 2.000000e+00 : f32
    %165 = vector.broadcast %cst_27 : f32 to vector<4x8x16xf32>
    %166 = arith.mulf %165, %160 : vector<4x8x16xf32>
    %167 = arith.addf %162, %166 : vector<4x8x16xf32>
    %168 = arith.addf %167, %164 : vector<4x8x16xf32>
    %169 = vector.extract_strided_slice %168 {offsets = [0, 0, 2], sizes = [4, 8, 14], strides = [1, 1, 1]} : vector<4x8x16xf32> to vector<4x8x14xf32>
    %170 = tpu.concatenate %169, %4 in 2 : vector<4x8x14xf32>, vector<4x8x2xf32> -> vector<4x8x16xf32>
    %171 = vector.extract_strided_slice %168 {offsets = [0, 0, 0], sizes = [4, 8, 14], strides = [1, 1, 1]} : vector<4x8x16xf32> to vector<4x8x14xf32>
    %172 = tpu.concatenate %4, %171 in 2 : vector<4x8x2xf32>, vector<4x8x14xf32> -> vector<4x8x16xf32>
    %173 = arith.subf %170, %172 : vector<4x8x16xf32>
    %174 = arith.subf %162, %164 : vector<4x8x16xf32>
    %175 = vector.extract_strided_slice %174 {offsets = [0, 0, 0], sizes = [4, 8, 14], strides = [1, 1, 1]} : vector<4x8x16xf32> to vector<4x8x14xf32>
    %176 = tpu.concatenate %4, %175 in 2 : vector<4x8x2xf32>, vector<4x8x14xf32> -> vector<4x8x16xf32>
    %cst_28 = arith.constant 2.000000e+00 : f32
    %177 = vector.broadcast %cst_28 : f32 to vector<4x8x16xf32>
    %178 = arith.mulf %177, %174 : vector<4x8x16xf32>
    %179 = arith.addf %176, %178 : vector<4x8x16xf32>
    %180 = vector.extract_strided_slice %174 {offsets = [0, 0, 2], sizes = [4, 8, 14], strides = [1, 1, 1]} : vector<4x8x16xf32> to vector<4x8x14xf32>
    %181 = tpu.concatenate %180, %4 in 2 : vector<4x8x14xf32>, vector<4x8x2xf32> -> vector<4x8x16xf32>
    %182 = arith.addf %179, %181 : vector<4x8x16xf32>
    %183 = math.absf %173 : vector<4x8x16xf32>
    %184 = math.absf %182 : vector<4x8x16xf32>
    %185 = arith.addf %183, %184 : vector<4x8x16xf32>
    %186 = arith.subf %24, %22 : vector<4x8x16xf32>
    %187 = vector.extract_strided_slice %186 {offsets = [0, 0, 0], sizes = [4, 7, 16], strides = [1, 1, 1]} : vector<4x8x16xf32> to vector<4x7x16xf32>
    %188 = tpu.concatenate %5, %187 in 1 : vector<4x1x16xf32>, vector<4x7x16xf32> -> vector<4x8x16xf32>
    %189 = vector.extract_strided_slice %186 {offsets = [0, 1, 0], sizes = [4, 7, 16], strides = [1, 1, 1]} : vector<4x8x16xf32> to vector<4x7x16xf32>
    %190 = tpu.concatenate %189, %5 in 1 : vector<4x7x16xf32>, vector<4x1x16xf32> -> vector<4x8x16xf32>
    %cst_29 = arith.constant 2.000000e+00 : f32
    %191 = vector.broadcast %cst_29 : f32 to vector<4x8x16xf32>
    %192 = arith.mulf %191, %186 : vector<4x8x16xf32>
    %193 = arith.addf %188, %192 : vector<4x8x16xf32>
    %194 = arith.addf %193, %190 : vector<4x8x16xf32>
    %195 = vector.extract_strided_slice %194 {offsets = [0, 0, 2], sizes = [4, 8, 14], strides = [1, 1, 1]} : vector<4x8x16xf32> to vector<4x8x14xf32>
    %196 = tpu.concatenate %195, %4 in 2 : vector<4x8x14xf32>, vector<4x8x2xf32> -> vector<4x8x16xf32>
    %197 = vector.extract_strided_slice %194 {offsets = [0, 0, 0], sizes = [4, 8, 14], strides = [1, 1, 1]} : vector<4x8x16xf32> to vector<4x8x14xf32>
    %198 = tpu.concatenate %4, %197 in 2 : vector<4x8x2xf32>, vector<4x8x14xf32> -> vector<4x8x16xf32>
    %199 = arith.subf %196, %198 : vector<4x8x16xf32>
    %200 = arith.subf %188, %190 : vector<4x8x16xf32>
    %201 = vector.extract_strided_slice %200 {offsets = [0, 0, 0], sizes = [4, 8, 14], strides = [1, 1, 1]} : vector<4x8x16xf32> to vector<4x8x14xf32>
    %202 = tpu.concatenate %4, %201 in 2 : vector<4x8x2xf32>, vector<4x8x14xf32> -> vector<4x8x16xf32>
    %cst_30 = arith.constant 2.000000e+00 : f32
    %203 = vector.broadcast %cst_30 : f32 to vector<4x8x16xf32>
    %204 = arith.mulf %203, %200 : vector<4x8x16xf32>
    %205 = arith.addf %202, %204 : vector<4x8x16xf32>
    %206 = vector.extract_strided_slice %200 {offsets = [0, 0, 2], sizes = [4, 8, 14], strides = [1, 1, 1]} : vector<4x8x16xf32> to vector<4x8x14xf32>
    %207 = tpu.concatenate %206, %4 in 2 : vector<4x8x14xf32>, vector<4x8x2xf32> -> vector<4x8x16xf32>
    %208 = arith.addf %205, %207 : vector<4x8x16xf32>
    %209 = math.absf %199 : vector<4x8x16xf32>
    %210 = math.absf %208 : vector<4x8x16xf32>
    %211 = arith.addf %209, %210 : vector<4x8x16xf32>
    %212 = arith.maximumf %185, %211 : vector<4x8x16xf32>
    %213 = arith.subf %34, %32 : vector<4x8x16xf32>
    %214 = arith.subf %213, %212 : vector<4x8x16xf32>
    %215 = math.absf %214 : vector<4x8x16xf32>
    %cst_31 = arith.constant dense<0.000000e+00> : vector<8x16xf32>
    %216 = vector.multi_reduction <add>, %215, %cst_31 [0] : vector<4x8x16xf32> to vector<8x16xf32>
    %cst_32 = arith.constant dense<0.000000e+00> : vector<16xf32>
    %217 = vector.multi_reduction <add>, %216, %cst_32 [0] : vector<8x16xf32> to vector<16xf32>
    %218 = vector.shape_cast %217 : vector<16xf32> to vector<1x16xf32>
    %c0_33 = arith.constant 0 : index
    %c2 = arith.constant 2 : index
    %c0_34 = arith.constant 0 : index
    %219 = vector.load %arg4[%c0_33, %c2, %c0_34] : memref<1x4x16xf32, #tpu.memory_space<vmem>>, vector<1x1x16xf32>
    %220 = vector.shape_cast %219 : vector<1x1x16xf32> to vector<1x16xf32>
    %221 = vector.shape_cast %218 : vector<1x16xf32> to vector<1x1x16xf32>
    tpu.vector_store %arg4[%c0_33, %c2, %c0_34], %221 {strides = array<i32>} : memref<1x4x16xf32, #tpu.memory_space<vmem>>, vector<1x1x16xf32>,
    %222 = arith.subf %15, %13 : vector<4x8x16xf32>
    %223 = vector.extract_strided_slice %222 {offsets = [0, 0, 0], sizes = [4, 7, 16], strides = [1, 1, 1]} : vector<4x8x16xf32> to vector<4x7x16xf32>
    %224 = tpu.concatenate %5, %223 in 1 : vector<4x1x16xf32>, vector<4x7x16xf32> -> vector<4x8x16xf32>
    %225 = vector.extract_strided_slice %222 {offsets = [0, 1, 0], sizes = [4, 7, 16], strides = [1, 1, 1]} : vector<4x8x16xf32> to vector<4x7x16xf32>
    %226 = tpu.concatenate %225, %5 in 1 : vector<4x7x16xf32>, vector<4x1x16xf32> -> vector<4x8x16xf32>
    %cst_35 = arith.constant 2.000000e+00 : f32
    %227 = vector.broadcast %cst_35 : f32 to vector<4x8x16xf32>
    %228 = arith.mulf %227, %222 : vector<4x8x16xf32>
    %229 = arith.addf %224, %228 : vector<4x8x16xf32>
    %230 = arith.addf %229, %226 : vector<4x8x16xf32>
    %231 = vector.extract_strided_slice %230 {offsets = [0, 0, 2], sizes = [4, 8, 14], strides = [1, 1, 1]} : vector<4x8x16xf32> to vector<4x8x14xf32>
    %232 = tpu.concatenate %231, %4 in 2 : vector<4x8x14xf32>, vector<4x8x2xf32> -> vector<4x8x16xf32>
    %233 = vector.extract_strided_slice %230 {offsets = [0, 0, 0], sizes = [4, 8, 14], strides = [1, 1, 1]} : vector<4x8x16xf32> to vector<4x8x14xf32>
    %234 = tpu.concatenate %4, %233 in 2 : vector<4x8x2xf32>, vector<4x8x14xf32> -> vector<4x8x16xf32>
    %235 = arith.subf %232, %234 : vector<4x8x16xf32>
    %236 = arith.subf %224, %226 : vector<4x8x16xf32>
    %237 = vector.extract_strided_slice %236 {offsets = [0, 0, 0], sizes = [4, 8, 14], strides = [1, 1, 1]} : vector<4x8x16xf32> to vector<4x8x14xf32>
    %238 = tpu.concatenate %4, %237 in 2 : vector<4x8x2xf32>, vector<4x8x14xf32> -> vector<4x8x16xf32>
    %cst_36 = arith.constant 2.000000e+00 : f32
    %239 = vector.broadcast %cst_36 : f32 to vector<4x8x16xf32>
    %240 = arith.mulf %239, %236 : vector<4x8x16xf32>
    %241 = arith.addf %238, %240 : vector<4x8x16xf32>
    %242 = vector.extract_strided_slice %236 {offsets = [0, 0, 2], sizes = [4, 8, 14], strides = [1, 1, 1]} : vector<4x8x16xf32> to vector<4x8x14xf32>
    %243 = tpu.concatenate %242, %4 in 2 : vector<4x8x14xf32>, vector<4x8x2xf32> -> vector<4x8x16xf32>
    %244 = arith.addf %241, %243 : vector<4x8x16xf32>
    %245 = math.absf %235 : vector<4x8x16xf32>
    %246 = math.absf %244 : vector<4x8x16xf32>
    %247 = arith.addf %245, %246 : vector<4x8x16xf32>
    %248 = arith.subf %25, %23 : vector<4x8x16xf32>
    %249 = vector.extract_strided_slice %248 {offsets = [0, 0, 0], sizes = [4, 7, 16], strides = [1, 1, 1]} : vector<4x8x16xf32> to vector<4x7x16xf32>
    %250 = tpu.concatenate %5, %249 in 1 : vector<4x1x16xf32>, vector<4x7x16xf32> -> vector<4x8x16xf32>
    %251 = vector.extract_strided_slice %248 {offsets = [0, 1, 0], sizes = [4, 7, 16], strides = [1, 1, 1]} : vector<4x8x16xf32> to vector<4x7x16xf32>
    %252 = tpu.concatenate %251, %5 in 1 : vector<4x7x16xf32>, vector<4x1x16xf32> -> vector<4x8x16xf32>
    %cst_37 = arith.constant 2.000000e+00 : f32
    %253 = vector.broadcast %cst_37 : f32 to vector<4x8x16xf32>
    %254 = arith.mulf %253, %248 : vector<4x8x16xf32>
    %255 = arith.addf %250, %254 : vector<4x8x16xf32>
    %256 = arith.addf %255, %252 : vector<4x8x16xf32>
    %257 = vector.extract_strided_slice %256 {offsets = [0, 0, 2], sizes = [4, 8, 14], strides = [1, 1, 1]} : vector<4x8x16xf32> to vector<4x8x14xf32>
    %258 = tpu.concatenate %257, %4 in 2 : vector<4x8x14xf32>, vector<4x8x2xf32> -> vector<4x8x16xf32>
    %259 = vector.extract_strided_slice %256 {offsets = [0, 0, 0], sizes = [4, 8, 14], strides = [1, 1, 1]} : vector<4x8x16xf32> to vector<4x8x14xf32>
    %260 = tpu.concatenate %4, %259 in 2 : vector<4x8x2xf32>, vector<4x8x14xf32> -> vector<4x8x16xf32>
    %261 = arith.subf %258, %260 : vector<4x8x16xf32>
    %262 = arith.subf %250, %252 : vector<4x8x16xf32>
    %263 = vector.extract_strided_slice %262 {offsets = [0, 0, 0], sizes = [4, 8, 14], strides = [1, 1, 1]} : vector<4x8x16xf32> to vector<4x8x14xf32>
    %264 = tpu.concatenate %4, %263 in 2 : vector<4x8x2xf32>, vector<4x8x14xf32> -> vector<4x8x16xf32>
    %cst_38 = arith.constant 2.000000e+00 : f32
    %265 = vector.broadcast %cst_38 : f32 to vector<4x8x16xf32>
    %266 = arith.mulf %265, %262 : vector<4x8x16xf32>
    %267 = arith.addf %264, %266 : vector<4x8x16xf32>
    %268 = vector.extract_strided_slice %262 {offsets = [0, 0, 2], sizes = [4, 8, 14], strides = [1, 1, 1]} : vector<4x8x16xf32> to vector<4x8x14xf32>
    %269 = tpu.concatenate %268, %4 in 2 : vector<4x8x14xf32>, vector<4x8x2xf32> -> vector<4x8x16xf32>
    %270 = arith.addf %267, %269 : vector<4x8x16xf32>
    %271 = math.absf %261 : vector<4x8x16xf32>
    %272 = math.absf %270 : vector<4x8x16xf32>
    %273 = arith.addf %271, %272 : vector<4x8x16xf32>
    %274 = arith.maximumf %247, %273 : vector<4x8x16xf32>
    %275 = arith.subf %35, %33 : vector<4x8x16xf32>
    %276 = arith.subf %275, %274 : vector<4x8x16xf32>
    %277 = math.absf %276 : vector<4x8x16xf32>
    %cst_39 = arith.constant dense<0.000000e+00> : vector<8x16xf32>
    %278 = vector.multi_reduction <add>, %277, %cst_39 [0] : vector<4x8x16xf32> to vector<8x16xf32>
    %cst_40 = arith.constant dense<0.000000e+00> : vector<16xf32>
    %279 = vector.multi_reduction <add>, %278, %cst_40 [0] : vector<8x16xf32> to vector<16xf32>
    %280 = vector.shape_cast %279 : vector<16xf32> to vector<1x16xf32>
    %c0_41 = arith.constant 0 : index
    %c3 = arith.constant 3 : index
    %c0_42 = arith.constant 0 : index
    %281 = vector.load %arg4[%c0_41, %c3, %c0_42] : memref<1x4x16xf32, #tpu.memory_space<vmem>>, vector<1x1x16xf32>
    %282 = vector.shape_cast %281 : vector<1x1x16xf32> to vector<1x16xf32>
    %283 = vector.shape_cast %280 : vector<1x16xf32> to vector<1x1x16xf32>
    tpu.vector_store %arg4[%c0_41, %c3, %c0_42], %283 {strides = array<i32>} : memref<1x4x16xf32, #tpu.memory_space<vmem>>, vector<1x1x16xf32>,
    return
  }
  func.func @transform_0(%arg0: i32) -> (i32, i32, i32) {
    %c0_i32 = arith.constant 0 : i32
    %c0_i32_0 = arith.constant 0 : i32
    %c0_i32_1 = arith.constant 0 : i32
    return %arg0, %c0_i32, %c0_i32_0 : i32, i32, i32
  }
  func.func @transform_1(%arg0: i32) -> (i32, i32, i32) {
    %c0_i32 = arith.constant 0 : i32
    %c0_i32_0 = arith.constant 0 : i32
    %c0_i32_1 = arith.constant 0 : i32
    return %arg0, %c0_i32, %c0_i32_0 : i32, i32, i32
  }
  func.func @transform_2(%arg0: i32) -> (i32, i32, i32) {
    %c0_i32 = arith.constant 0 : i32
    %c0_i32_0 = arith.constant 0 : i32
    %c0_i32_1 = arith.constant 0 : i32
    return %arg0, %c0_i32, %c0_i32_0 : i32, i32, i32
  }
  func.func @transform_3(%arg0: i32) -> (i32, i32, i32) {
    %c0_i32 = arith.constant 0 : i32
    %c0_i32_0 = arith.constant 0 : i32
    %c0_i32_1 = arith.constant 0 : i32
    return %arg0, %c0_i32, %c0_i32_0 : i32, i32, i32
  }
}

</mosaic_0001>

<bundles_post_ra>
// kernel: tpu_custom_call.1
= control target key start
LH: loop header
LB: loop body
LE: loop exit
PB: predicated region body
PF: predicated region fallthrough
CT: control target
= control target key end

     0   :  { %s4020_s0 = inlined_call_operand.hbm [shape: f32[8,8,32], index: 0, kind: input, shape index: {}]   ;;  %s4021_s1 = inlined_call_operand.hbm [shape: f32[8,8,32], index: 1, kind: input, shape index: {}]   ;;  %s4022_s2 = inlined_call_operand.hbm [shape: f32[8,8,32], index: 2, kind: input, shape index: {}]   ;;  %s4023_s3 = inlined_call_operand.hbm [shape: f32[2,4,16], index: 3, kind: output, shape index: {}]  }
   0x1   :  { %4063 = sst [smem:[#allocation69_spill]] %s4020_s0 }
   0x2   :  { %4064 = sst [smem:[#allocation70_spill]] %s4021_s1 }
   0x3   :  { %8 = vsyncpa [#allocation3], 0 }
   0x4   :  { %10 = vsyncpa [#allocation3 + $0x1], 0 }
   0x5   :  { %11 = vsyncpa [#allocation6], 0 }
   0x6   :  { %13 = vsyncpa [#allocation6 + $0x1], 0 }
   0x7   :  { %14 = vsyncpa [#allocation4], 0 }
   0x8   :  { %16 = vsyncpa [#allocation4 + $0x1], 0  ;;  %s2434_s12 = smov 0   ;;  %s2436_s13 = smov 0  }
   0x9   :  { %s2438_s14 = smov 0   ;;  %s2440_s15 = smov 0  }
   0xa LB: > { %s2455_s16 = sadd.s32 4294967295, %s2400_s15   ;;  %s2160_s17 = sadd.s32 4294967294, %s2400_s15   ;;  %s2400_s15 = sphi %s2440_s15, %s4202_s15   ;;  %s2396_s14 = sphi %s2438_s14, %s4201_s14   ;;  %s2392_s13 = sphi %s2436_s13, %s4200_s13   ;;  %s2388_s12 = sphi %s2434_s12, %s4199_s12  }
   0xb   : > { %s2459_s18 = sadd.s32 1, %s2400_s15   ;;  %s29_s19 = sadd.s32 1, %s2396_s14 }
   0xc   : > { %s26_s20 = ssub.s32 %s2400_s15, %s2459_s18  ;;  %p36_p0 = scmp.ne.s32.totalorder %s2396_s14, %s2392_s13 }
   0xd   : > { %p27_p1 = scmp.eq.s32.totalorder %s26_s20, 0  ;;  %p37_p2 = scmp.eq.s32.totalorder %s2400_s15, 0 }
   0xe   : > { %p42_p3 = scmp.ne.s32.totalorder %s2392_s13, %s2388_s12  ;;  %p43_p4 = scmp.eq.s32.totalorder %s2455_s16, 0 }
   0xf   : > { %s2471_s21 = scalar_select %p27_p1, %s2396_s14, %s29_s19  }
  0x10   : > { %p38_p5 = por %p37_p2, %p36_p0  ;;  %p2473_p6 = por %p43_p4, %p42_p3 }
  0x11   : > { %p118_p7 = scmp.eq.s32.totalorder %s2455_s16, 1  ;;  %p124_p8 = scmp.eq.s32.totalorder %s2160_s17, 1 }
  0x12   : > { %s4065_s22 = scalar_select %p2473_p6, 1, 0 }
  0x13   : > { %p2206_p10 = scmp.lt.s32.totalorder %s2400_s15, 2  ;;  %p2480_p11 = por %p118_p7, %p36_p0 }
  0x14   : > { %p2484_p12 = por %p124_p8, %p42_p3  ;;  %s144_s25 = sand.u32 1, %s2396_s14  }
  0x15   : > { %s4066_s23 = scalar_select %p2480_p11, 1, 0 }
  0x16   : > { %s4067_s24 = scalar_select %p2484_p12, 1, 0 }
  0x17   : > { %s2490_s26 = sshll.u32 %s2400_s15, 9  ;;  %s2494_s27 = sshll.u32 %s144_s25, 5 }
  0x18   : > { %p2496_p13 = pnand %p2206_p10, %p38_p5  ;;  %s165_s29 = sand.u32 1, %s2400_s15  }
  0x19   : > { %s4069_s1 = sld [smem:[#allocation70_spill]]  ;;  %s169_s6 = scalar_lea.vmem [#allocation5], %s2494_s27 }
  0x1a   : > { %s176_s7 = sshll.u32 %s169_s6, 4  ;;  %s2511_s8 = scalar_lea.sflag [#allocation6], %s165_s29  ;;  %s2508_s7 = int_to_ptr.vmem [resolvable:$true] %s176_s7 }
  0x1b   : > { %p2517_p2 = pneg %p2496_p13 }
  0x1f   : > { %s2505_s5 = scalar_lea.hbm %s4069_s1, %s2490_s26  ;;  %s2253_s19 = scalar_lea.hbm %s4069_s1, 1024 }
  0x20   : > { %s2248_s9 = scalar_lea.hbm %s2505_s5, 512  ;;  %p2254_p5 = scmp.lt.s32.totalorder %s2505_s5, %s4069_s1 }
  0x21   : > { %p2249_p1 = scmp.ne.s32.totalorder %s2505_s5, %s2248_s9  ;;  %p2255_p7 = scmp.lt.s32.totalorder %s2253_s19, %s2248_s9 }
  0x23   : > { %p2251_p3 = pnand %p2517_p2, %p2249_p1  ;;  %p2256_p8 = por %p2255_p7, %p2254_p5 }
  0x25   : > { %p2252_p4 = pneg %p2251_p3 }
  0x27   : > { %p2257_p10 = pnand %p2256_p8, %p2252_p4 }
  0x29   : > { %2260 = shalt.err (!%p2257_p10)
}
  0x2a   : > { %s2261_s29 = scalar_lea.vmem %s2508_s7, 512  ;;  %s2402_s4 = smov [#allocation5]  }
  0x2b   : > { %p2262_p9 = scmp.ne.s32.totalorder %s2508_s7, %s2261_s29  ;;  %s2266_s6 = sshll.u32 %s2402_s4, 4  ;;  %s2267_s6 = int_to_ptr.vmem [resolvable:$false] %s2266_s6 }
  0x2c   : > { %s2268_s11 = scalar_lea.vmem %s2267_s6, 1024  ;;  %p2269_p0 = scmp.lt.s32.totalorder %s2508_s7, %s2267_s6 }
  0x2d   : > { %p2264_p1 = pnand %p2262_p9, %p2517_p2  ;;  %p2270_p12 = scmp.lt.s32.totalorder %s2268_s11, %s2261_s29 }
  0x2f   : > { %p2265_p3 = pneg %p2264_p1  ;;  %p2271_p11 = por %p2270_p12, %p2269_p0 }
  0x31   : > { %p2272_p6 = pnand %p2271_p11, %p2265_p3 }
  0x33   : > { %2275 = shalt.err (!%p2272_p6)
}
  0x34   : > { %s4026_s9 = smov 128   ;;  %s4028_s17 = smov 8  }
  0x35   : > { %2198 = dma.hbm_to_vmem [thread:$0]  (!%p2496_p13), %s2505_s5, 512, %s2508_s7, %s2511_s8, %s4026_s9, %s4026_s9, %s4028_s17  }
  0x36   : > { %p205_p9 = scmp.lt.s32.totalorder %s2400_s15, 3  ;;  %s4071_s0 = sld [smem:[#allocation69_spill]] }
  0x37   : > { %p4072_p6 = scmp.ge.s32.totalorder %s2400_s15, 1  ;;  %s148_s4 = scalar_lea.vmem [#allocation2], %s2494_s27 }
  0x38   : > { %s155_s6 = sshll.u32 %s148_s4, 4  ;;  %s145_s5 = scalar_lea.sflag [#allocation3], %s144_s25  ;;  %s2557_s6 = int_to_ptr.vmem [resolvable:$true] %s155_s6 }
  0x39   : > { %p2552_p11 = pnand %p4072_p6, %p205_p9 }
  0x3b   : > { %s4073_s29 = scalar_select %p2552_p11, 1, 0 }
  0x3c   : > { %s2548_s30 = scalar_lea.hbm %s4071_s0, %s2490_s26  ;;  %s2281_s20 = scalar_lea.hbm %s4071_s0, 1024 }
  0x3d   : > { %s2276_s7 = scalar_lea.hbm %s2548_s30, 512  ;;  %p2282_p5 = scmp.lt.s32.totalorder %s2548_s30, %s4071_s0 }
  0x3e   : > { %p2277_p12 = scmp.ne.s32.totalorder %s2548_s30, %s2276_s7  ;;  %p2283_p7 = scmp.lt.s32.totalorder %s2281_s20, %s2276_s7 }
  0x40   : > { %p2279_p0 = pnand %p2277_p12, %p2517_p2  ;;  %p2284_p8 = por %p2283_p7, %p2282_p5 }
  0x42   : > { %p2280_p4 = pneg %p2279_p0 }
  0x44   : > { %p2285_p10 = pnand %p2284_p8, %p2280_p4 }
  0x46   : > { %2288 = shalt.err (!%p2285_p10)
}
  0x47   : > { %s2289_s25 = scalar_lea.vmem %s2557_s6, 512  ;;  %s2405_s4 = smov [#allocation2]  }
  0x48   : > { %p2290_p1 = scmp.ne.s32.totalorder %s2557_s6, %s2289_s25  ;;  %s2294_s11 = sshll.u32 %s2405_s4, 4  ;;  %s2295_s11 = int_to_ptr.vmem [resolvable:$false] %s2294_s11 }
  0x49   : > { %s2296_s19 = scalar_lea.vmem %s2295_s11, 1024  ;;  %p2297_p6 = scmp.lt.s32.totalorder %s2557_s6, %s2295_s11 }
  0x4a   : > { %p2292_p3 = pnand %p2290_p1, %p2517_p2  ;;  %p2298_p12 = scmp.lt.s32.totalorder %s2296_s19, %s2289_s25 }
  0x4c   : > { %p2293_p9 = pneg %p2292_p3  ;;  %p2299_p0 = por %p2298_p12, %p2297_p6 }
  0x4e   : > { %p2300_p11 = pnand %p2299_p0, %p2293_p9 }
  0x50   : > { %2303 = shalt.err (!%p2300_p11)
}
  0x51   : > { %s4074_s9 = smov 8   ;;  %s4075_s17 = smov 128  }
  0x52   : > { %2195 = dma.hbm_to_vmem [thread:$0]  (!%p2496_p13), %s2548_s30, 512, %s2557_s6, %s145_s5, %s4075_s17, %s4075_s17, %s4074_s9  }
  0x53   : > { %s2588_s4 = scalar_lea.hbm %s4022_s2, %s2490_s26  ;;  %s190_s25 = scalar_lea.vmem [#allocation7], %s2494_s27 }
  0x54   : > { %s197_s11 = sshll.u32 %s190_s25, 4  ;;  %s2304_s19 = scalar_lea.hbm %s2588_s4, 512  ;;  %s198_s11 = int_to_ptr.vmem [resolvable:$true] %s197_s11 }
  0x55   : > { %p2305_p11 = scmp.ne.s32.totalorder %s2588_s4, %s2304_s19  ;;  %s2309_s30 = scalar_lea.hbm %s4022_s2, 1024 }
  0x56   : > { %p2310_p7 = scmp.lt.s32.totalorder %s2588_s4, %s4022_s2  ;;  %p2311_p8 = scmp.lt.s32.totalorder %s2309_s30, %s2304_s19 }
  0x57   : > { %p2307_p4 = pnand %p2305_p11, %p2517_p2 }
  0x58   : > { %p2312_p10 = por %p2311_p8, %p2310_p7 }
  0x59   : > { %p2308_p5 = pneg %p2307_p4 }
  0x5b   : > { %p2313_p1 = pnand %p2312_p10, %p2308_p5 }
  0x5d   : > { %2316 = shalt.err (!%p2313_p1)
}
  0x5e   : > { %s2317_s26 = scalar_lea.vmem %s198_s11, 512  ;;  %s2406_s27 = smov [#allocation7]  }
  0x5f   : > { %p2318_p3 = scmp.ne.s32.totalorder %s198_s11, %s2317_s26  ;;  %s2322_s7 = sshll.u32 %s2406_s27, 4  ;;  %s2323_s7 = int_to_ptr.vmem [resolvable:$false] %s2322_s7 }
  0x60   : > { %s2324_s20 = scalar_lea.vmem %s2323_s7, 1024  ;;  %p2325_p12 = scmp.lt.s32.totalorder %s198_s11, %s2323_s7 }
  0x61   : > { %p2320_p9 = pnand %p2318_p3, %p2517_p2  ;;  %p2326_p0 = scmp.lt.s32.totalorder %s2324_s20, %s2317_s26 }
  0x63   : > { %p2321_p6 = pneg %p2320_p9  ;;  %p2327_p11 = por %p2326_p0, %p2325_p12 }
  0x65   : > { %p2328_p4 = pnand %p2327_p11, %p2321_p6 }
  0x67   : > { %2331 = shalt.err (!%p2328_p4)
}
  0x68   : > { %2201 = dma.hbm_to_vmem [thread:$0]  (!%p2496_p13), %s2588_s4, 512, %s198_s11, %s2511_s8, %s4075_s17, %s4075_s17, %s4074_s9  }
  0x69   : > { %p4076_p2 = scmp.ne.s32.totalorder %s4073_s29, 0 }
  0x6b   : > { %209 = sbr.rel (%p4076_p2) target bundleno = 1055 (0x41f), region = 32 }
  0x70   : > { %s2614_s0 = sand.u32 1, %s2392_s13   ;;  %p4077_p5 = scmp.ne.s32.totalorder %s4065_s22, 0 }
  0x71   : > { %s2617_s1 = sshll.u32 %s2614_s0, 5  ;;  %s212_s10 = scalar_lea.sflag [#allocation3], %s2614_s0 }
  0x72   : > { %s215_s28 = scalar_lea.vmem [#allocation2], %s2617_s1 }
  0x73   : > { %2375 = dma.done.wait (%p4077_p5), %s212_s10, 512  }
  0x74   : > { %2377 = vsyncadd (%p4077_p5), %s212_s10, 4294966784  ;;  %s220_s8 = sand.u32 1, %s2455_s16   ;;  %s224_s9 = scalar_lea.vmem [#allocation5], %s2617_s1 }
  0x75   : > { %s221_s29 = scalar_lea.sflag [#allocation6], %s220_s8 }
  0x76   : > { %2379 = dma.done.wait (%p4077_p5), %s221_s29, 1024  }
  0x77   : > { %2381 = vsyncadd (%p4077_p5), %s221_s29, 4294966272  ;;  %v2631_v0 = vld [vmem:[%s215_s28 + $0x10] sm:$0xff]  ;;  %v2633_v1 = vld [vmem:[%s215_s28] sm:$0xff]  ;;  %s2407_s17 = smov 127   ;;  %s2408_s22 = smov 111   ;;  %vm297_vm0 = vcmask 121856  }
  0x78   : > { %289 = vrot.lane.b32.xlu1 %v2631_v0, %s2407_s17  ;;  %285 = vrot.lane.b32.xlu0 %v2633_v1, %s2407_s17  ;;  %v2639_v2 = vld [vmem:[%s215_s28 + $0x18] sm:$0xff]  ;;  %v2641_v3 = vld [vmem:[%s215_s28 + $0x8] sm:$0xff]  ;;  %s2409_s4 = smov 112   ;;  %s233_s25 = scalar_lea.vmem [#allocation7], %s2617_s1  ;;  %vm554_vm1 = vcmask 1040384   ;;  %vm567_vm2 = vcmask 1046528  }
  0x79   : > { %v2663_v4 = vld [vmem:[%s224_s9 + $0x8] sm:$0xff]  ;;  %v2665_v5 = vld [vmem:[%s224_s9] sm:$0xff]  ;;  %v2671_v6 = vld [vmem:[%s224_s9 + $0x18] sm:$0xff]  ;;  %s2410_s11 = smov 16   ;;  %s2411_s19 = smov 126   ;;  %vm617_vm3 = vcmask 15360  }
  0x7a   : > { %v2673_v7 = vld [vmem:[%s224_s9 + $0x10] sm:$0xff]  ;;  %v2696_v8 = vld [vmem:[%s233_s25 + $0x8] sm:$0xff]  ;;  %v2698_v9 = vld [vmem:[%s233_s25] sm:$0xff]  ;;  %s2412_s30 = smov 2   ;;  %vm600_vm4 = vcmask 113664   ;;  %vm886_vm5 = vcmask 130048  }
  0x7b   : > { %v2704_v10 = vld [vmem:[%s233_s25 + $0x18] sm:$0xff]  ;;  %v2706_v11 = vld [vmem:[%s233_s25 + $0x10] sm:$0xff]  ;;  %s2176_s6 = sshll.u32 %s2614_s0, 2  ;;  %vm901_vm6 = vcmask 122880   ;;  %vm1686_vm7 = vcmask 261248   ;;  %s2178_s26 = sshll.u32 %s2455_s16, 6 }
  0x7c   : > { %291 = vrot.lane.b32.xlu1 %v2639_v2, %s2407_s17  ;;  %287 = vrot.lane.b32.xlu0 %v2641_v3, %s2407_s17  ;;  %s3695_s5 = scalar_lea.vmem [#allocation8], %s2176_s6  ;;  %s3981_s1 = scalar_lea.hbm %s4023_s3, %s2178_s26 }
  0x7d   : > { %s2047_s27 = sshll.u32 %s3695_s5, 4  ;;  %s2034_s10 = scalar_lea.sflag [#allocation4], %s2614_s0  ;;  %s2048_s27 = int_to_ptr.vmem [resolvable:$true] %s2047_s27 }
  0x7e   : > { %s2332_s28 = scalar_lea.vmem %s2048_s27, 64  ;;  %p4196_p7 = scmp.ne.s32.totalorder %s4066_s23, 0 }
  0x7f   : > { %p2333_p13 = scmp.ne.s32.totalorder %s2048_s27, %s2332_s28  ;;  %s2413_s8 = smov [#allocation8]  }
  0x80   : > { %304 = vrot.lane.b32.xlu1 %v2641_v3, %s2408_s22  ;;  %302 = vrot.lane.b32.xlu0 %v2633_v1, %s2408_s22  ;;  %s2336_s29 = sshll.u32 %s2413_s8, 4  ;;  %s2337_s29 = int_to_ptr.vmem [resolvable:$false] %s2336_s29 }
  0x81   : > { %p2334_p8 = pnand %p2333_p13, %p4196_p7  ;;  %s2338_s16 = scalar_lea.vmem %s2337_s29, 128 }
  0x82   : > { %p2339_p1 = scmp.lt.s32.totalorder %s2048_s27, %s2337_s29  ;;  %p2340_p3 = scmp.lt.s32.totalorder %s2338_s16, %s2332_s28 }
  0x83   : > { %p2335_p10 = pneg %p2334_p8 }
  0x84   : > { %308 = vrot.lane.b32.xlu1 %v2639_v2, %s2408_s22  ;;  %306 = vrot.lane.b32.xlu0 %v2631_v0, %s2408_s22  ;;  %p2341_p9 = por %p2340_p3, %p2339_p1 }
  0x86   : > { %p2342_p6 = pnand %p2341_p9, %p2335_p10 }
  0x88   : > { %348 = vrot.lane.b32.xlu1 %v2641_v3, %s2409_s4  ;;  %346 = vrot.lane.b32.xlu0 %v2633_v1, %s2409_s4 }
  0x8c   : > { %352 = vrot.lane.b32.xlu1 %v2639_v2, %s2409_s4  ;;  %350 = vrot.lane.b32.xlu0 %v2631_v0, %s2409_s4 }
  0x90   : > { %368 = vrot.lane.b32.xlu1 %v2663_v4, %s2407_s17  ;;  %366 = vrot.lane.b32.xlu0 %v2665_v5, %s2407_s17 }
  0x94   : > { %372 = vrot.lane.b32.xlu1 %v2671_v6, %s2407_s17  ;;  %370 = vrot.lane.b32.xlu0 %v2673_v7, %s2407_s17 }
  0x98   : > { %384 = vrot.lane.b32.xlu1 %v2663_v4, %s2408_s22  ;;  %382 = vrot.lane.b32.xlu0 %v2665_v5, %s2408_s22 }
  0x9c   : > { %388 = vrot.lane.b32.xlu1 %v2671_v6, %s2408_s22  ;;  %386 = vrot.lane.b32.xlu0 %v2673_v7, %s2408_s22 }
  0xa0   : > { %428 = vrot.lane.b32.xlu1 %v2663_v4, %s2409_s4  ;;  %426 = vrot.lane.b32.xlu0 %v2665_v5, %s2409_s4 }
  0xa4   : > { %432 = vrot.lane.b32.xlu1 %v2671_v6, %s2409_s4  ;;  %430 = vrot.lane.b32.xlu0 %v2673_v7, %s2409_s4 }
  0xa8   : > { %448 = vrot.lane.b32.xlu1 %v2696_v8, %s2407_s17  ;;  %446 = vrot.lane.b32.xlu0 %v2698_v9, %s2407_s17 }
  0xac   : > { %452 = vrot.lane.b32.xlu1 %v2704_v10, %s2407_s17  ;;  %450 = vrot.lane.b32.xlu0 %v2706_v11, %s2407_s17 }
  0xb0   : > { %464 = vrot.lane.b32.xlu1 %v2696_v8, %s2408_s22  ;;  %462 = vrot.lane.b32.xlu0 %v2698_v9, %s2408_s22 }
  0xb4   : > { %468 = vrot.lane.b32.xlu1 %v2704_v10, %s2408_s22  ;;  %466 = vrot.lane.b32.xlu0 %v2706_v11, %s2408_s22 }
  0xb8   : > { %508 = vrot.lane.b32.xlu1 %v2696_v8, %s2409_s4  ;;  %506 = vrot.lane.b32.xlu0 %v2698_v9, %s2409_s4 }
  0xbc   : > { %512 = vrot.lane.b32.xlu1 %v2704_v10, %s2409_s4  ;;  %510 = vrot.lane.b32.xlu0 %v2706_v11, %s2409_s4 }
  0xea   : > { %v290_v12 = vpop.permute.xlu1 %289  ;;  %v286_v13 = vpop.permute.xlu0 %285 }
  0xeb   : > { %v2735_v24 = vsel %vm297_vm0, %v286_v13, 0.0  ;;  %v2763_v34 = vsel %vm297_vm0, %v290_v12, 0.0 }
  0xec   : > { %v2744_v28 = vsub.f32 %v2735_v24, %v2633_v1  ;;  %v324_v38 = vsub.f32 %v2763_v34, %v2631_v0 }
  0xee   : > { %v292_v14 = vpop.permute.xlu1 %291  ;;  %v288_v15 = vpop.permute.xlu0 %287 }
  0xef   : > { %v2738_v25 = vsel %vm297_vm0, %v288_v15, 0.0  ;;  %v2766_v35 = vsel %vm297_vm0, %v292_v14, 0.0 }
  0xf0   : > { %v2748_v29 = vsub.f32 %v2738_v25, %v2641_v3  ;;  %v325_v39 = vsub.f32 %v2766_v35, %v2639_v2 }
  0xf2   : > { %v305_v16 = vpop.permute.xlu1 %304  ;;  %v303_v17 = vpop.permute.xlu0 %302 }
  0xf3   : > { %v315_v18 = vsel %vm297_vm0, %v305_v16, 0.0  ;;  %v314_v19 = vsel %vm297_vm0, %v303_v17, 0.0 }
  0xf4   : > { %332 = vrot.lane.b32.xlu1 %v315_v18, %s2410_s11  ;;  %330 = vrot.lane.b32.xlu0 %v314_v19, %s2410_s11 }
  0xf6   : > { %v309_v20 = vpop.permute.xlu1 %308  ;;  %v307_v21 = vpop.permute.xlu0 %306 }
  0xf7   : > { %v317_v22 = vsel %vm297_vm0, %v309_v20, 0.0  ;;  %v316_v23 = vsel %vm297_vm0, %v307_v21, 0.0 }
  0xf8   : > { %336 = vrot.lane.b32.xlu1 %v317_v22, %s2410_s11  ;;  %334 = vrot.lane.b32.xlu0 %v316_v23, %s2410_s11 }
  0xfa   : > { %v349_v26 = vpop.permute.xlu1 %348  ;;  %v347_v27 = vpop.permute.xlu0 %346 }
  0xfb   : > { %v2750_v30 = vsub.f32 %v315_v18, %v349_v26  ;;  %v2752_v31 = vsub.f32 %v314_v19, %v347_v27 }
  0xfd   : > { %v2756_v32 = vsub.f32 %v2750_v30, %v2748_v29  ;;  %v2760_v33 = vsub.f32 %v2752_v31, %v2744_v28 }
  0xfe   : > { %v353_v36 = vpop.permute.xlu1 %352  ;;  %v351_v37 = vpop.permute.xlu0 %350 }
  0xff   : > { %v361_v40 = vsub.f32 %v317_v22, %v353_v36  ;;  %v360_v41 = vsub.f32 %v316_v23, %v351_v37 }
 0x101   : > { %v2772_v44 = vadd.f32 %v361_v40, %v325_v39  ;;  %v2774_v45 = vsub.f32 %v361_v40, %v325_v39  ;;  %v2776_v46 = vadd.f32 %v360_v41, %v324_v38  ;;  %v1708_v47 = vsub.f32 %v360_v41, %v324_v38 }
 0x102   : > { %v369_v42 = vpop.permute.xlu1 %368  ;;  %v367_v43 = vpop.permute.xlu0 %366 }
 0x103   : > { %4078 = vst [vmem:[#allocation12_spill] sm:$0xff] %v2774_v45  ;;  %v914_v48 = vrot.slane %v2772_v44, 7  ;;  %v913_v51 = vrot.slane %v2776_v46, 7  ;;  %v926_v55 = vrot.slane %v2772_v44, 1  ;;  %v925_v59 = vrot.slane %v2776_v46, 1 }
 0x104   : > { %v1716_v61 = vrot.slane %v1708_v47, 7  ;;  %v1728_v17 = vrot.slane %v1708_v47, 1  ;;  %v1740_v18 = vmul.f32 2.0, %v1708_v47  ;;  %v2809_v19 = vsel %vm297_vm0, %v369_v42, 0.0 }
 0x105   : > { %v2781_v54 = vsel %vm554_vm1, 0.0, %v914_v48  ;;  %v2787_v58 = vsel %vm554_vm1, 0.0, %v913_v51  ;;  %v2793_v60 = vsel %vm567_vm2, %v926_v55, 0.0  ;;  %v2800_v63 = vsel %vm567_vm2, %v925_v59, 0.0 }
 0x106   : > { %v373_v49 = vpop.permute.xlu1 %372  ;;  %v371_v50 = vpop.permute.xlu0 %370  ;;  %v2797_v62 = vsub.f32 %v2781_v54, %v2793_v60  ;;  %v2804_v14 = vsub.f32 %v2787_v58, %v2800_v63  ;;  %v2812_v20 = vsel %vm297_vm0, %v367_v43, 0.0  ;;  %v2817_v21 = vsel %vm554_vm1, 0.0, %v1716_v61 }
 0x107   : > { %v403_v26 = vsub.f32 %v2809_v19, %v2663_v4  ;;  %v402_v27 = vsub.f32 %v2812_v20, %v2665_v5  ;;  %v2824_v38 = vsel %vm567_vm2, %v1728_v17, 0.0  ;;  %v1744_v39 = vadd.f32 %v1740_v18, %v2817_v21 }
 0x108   : > { %4079 = vst [vmem:[#allocation13_spill] sm:$0xff] %v2797_v62  ;;  %4080 = vst [vmem:[#allocation14_spill] sm:$0xff] %v2804_v14 }
 0x109   : > { %v2836_v51 = vadd.f32 %v1744_v39, %v2824_v38 }
 0x10a   : > { %v385_v52 = vpop.permute.xlu1 %384  ;;  %v383_v53 = vpop.permute.xlu0 %382 }
 0x10b   : > { %v395_v56 = vsel %vm297_vm0, %v385_v52, 0.0  ;;  %v394_v57 = vsel %vm297_vm0, %v383_v53, 0.0  ;;  %4081 = vst [vmem:[#allocation15_spill] sm:$0xff] %v2836_v51  ;;  %v2839_v52 = vsel %vm297_vm0, %v373_v49, 0.0  ;;  %v2842_v53 = vsel %vm297_vm0, %v371_v50, 0.0 }
 0x10c   : > { %412 = vrot.lane.b32.xlu1 %v395_v56, %s2410_s11  ;;  %410 = vrot.lane.b32.xlu0 %v394_v57, %s2410_s11  ;;  %v405_v55 = vsub.f32 %v2839_v52, %v2671_v6 }
 0x10e   : > { %v389_v12 = vpop.permute.xlu1 %388  ;;  %v387_v13 = vpop.permute.xlu0 %386 }
 0x10f   : > { %v397_v15 = vsel %vm297_vm0, %v389_v12, 0.0  ;;  %v396_v16 = vsel %vm297_vm0, %v387_v13, 0.0 }
 0x110   : > { %416 = vrot.lane.b32.xlu1 %v397_v15, %s2410_s11  ;;  %414 = vrot.lane.b32.xlu0 %v396_v16, %s2410_s11 }
 0x112   : > { %v429_v22 = vpop.permute.xlu1 %428  ;;  %v427_v23 = vpop.permute.xlu0 %426 }
 0x113   : > { %v439_v36 = vsub.f32 %v395_v56, %v429_v22  ;;  %v438_v37 = vsub.f32 %v394_v57, %v427_v23  ;;  %v404_v56 = vsub.f32 %v2842_v53, %v2673_v7 }
 0x115   : > { %v2827_v40 = vadd.f32 %v439_v36, %v403_v26  ;;  %v2829_v41 = vsub.f32 %v439_v36, %v403_v26  ;;  %v2831_v42 = vadd.f32 %v438_v37, %v402_v27  ;;  %v2833_v43 = vsub.f32 %v438_v37, %v402_v27 }
 0x116   : > { %v433_v47 = vpop.permute.xlu1 %432  ;;  %v431_v48 = vpop.permute.xlu0 %430 }
 0x117   : > { %v441_v57 = vsub.f32 %v397_v15, %v433_v47  ;;  %v440_v59 = vsub.f32 %v396_v16, %v431_v48 }
 0x119   : > { %v2848_v13 = vadd.f32 %v441_v57, %v405_v55  ;;  %v2850_v17 = vsub.f32 %v441_v57, %v405_v55  ;;  %v1053_v18 = vadd.f32 %v440_v59, %v404_v56  ;;  %v2852_v49 = vsub.f32 %v440_v59, %v404_v56 }
 0x11a   : > { %v449_v61 = vpop.permute.xlu1 %448  ;;  %v447_v12 = vpop.permute.xlu0 %446 }
 0x11b   : > { %4082 = vst [vmem:[#allocation16_spill] sm:$0xff] %v2848_v13  ;;  %4083 = vst [vmem:[#allocation17_spill] sm:$0xff] %v2850_v17  ;;  %v1061_v23 = vrot.slane %v1053_v18, 7  ;;  %v1085_v15 = vmul.f32 2.0, %v1053_v18  ;;  %v1073_v16 = vrot.slane %v1053_v18, 1  ;;  %v459_v55 = vsel %vm297_vm0, %v449_v61, 0.0 }
 0x11c   : > { %4084 = vst [vmem:[#allocation18_spill] sm:$0xff] %v2852_v49  ;;  %v458_v59 = vsel %vm297_vm0, %v447_v12, 0.0  ;;  %v2870_v18 = vadd.f32 %v2735_v24, %v2633_v1  ;;  %v2877_v61 = vsub.f32 %v459_v55, %v2696_v8 }
 0x11d   : > { %v2859_v48 = vsel %vm554_vm1, 0.0, %v1061_v23  ;;  %v2874_v23 = vadd.f32 %v2738_v25, %v2641_v3  ;;  %v2880_v12 = vsel %vm567_vm2, %v1073_v16, 0.0 }
 0x11e   : > { %v453_v22 = vpop.permute.xlu1 %452  ;;  %v451_v50 = vpop.permute.xlu0 %450  ;;  %4085 = vst [vmem:[#allocation19_spill] sm:$0xff] %v2877_v61 }
 0x11f   : > { %v461_v25 = vsel %vm297_vm0, %v453_v22, 0.0  ;;  %v460_v51 = vsel %vm297_vm0, %v451_v50, 0.0  ;;  %v2912_v50 = vadd.f32 %v2809_v19, %v2663_v4 }
 0x122   : > { %v465_v26 = vpop.permute.xlu1 %464  ;;  %v463_v27 = vpop.permute.xlu0 %462 }
 0x123   : > { %v475_v36 = vsel %vm297_vm0, %v465_v26, 0.0  ;;  %v474_v37 = vsel %vm297_vm0, %v463_v27, 0.0  ;;  %v1089_v26 = vadd.f32 %v1085_v15, %v2859_v48 }
 0x124   : > { %492 = vrot.lane.b32.xlu1 %v475_v36, %s2410_s11  ;;  %490 = vrot.lane.b32.xlu0 %v474_v37, %s2410_s11 }
 0x125   : > { %v2890_v24 = vadd.f32 %v1089_v26, %v2880_v12  ;;  %v2916_v26 = vadd.f32 %v2812_v20, %v2665_v5  ;;  %v2954_v20 = vadd.f32 %v2842_v53, %v2673_v7 }
 0x126   : > { %v469_v39 = vpop.permute.xlu1 %468  ;;  %v467_v47 = vpop.permute.xlu0 %466 }
 0x127   : > { %v477_v56 = vsel %vm297_vm0, %v469_v39, 0.0  ;;  %v476_v57 = vsel %vm297_vm0, %v467_v47, 0.0  ;;  %v2883_v47 = vsub.f32 %v458_v59, %v2698_v9  ;;  %4089 = vst [vmem:[#allocation23_spill] sm:$0xff] %v2890_v24 }
 0x128   : > { %496 = vrot.lane.b32.xlu1 %v477_v56, %s2410_s11  ;;  %494 = vrot.lane.b32.xlu0 %v476_v57, %s2410_s11 }
 0x129   : > { %4086 = vst [vmem:[#allocation20_spill] sm:$0xff] %v2883_v47 }
 0x12a   : > { %v509_v27 = vpop.permute.xlu1 %508  ;;  %v507_v39 = vpop.permute.xlu0 %506 }
 0x12b   : > { %v2885_v15 = vsub.f32 %v475_v36, %v509_v27  ;;  %v2887_v17 = vsub.f32 %v474_v37, %v507_v39  ;;  %v2922_v36 = vsub.f32 %v460_v51, %v2706_v11 }
 0x12c   : > { %1234 = vrot.lane.b32.xlu1 %v2870_v18, %s2410_s11  ;;  %1236 = vrot.lane.b32.xlu0 %v2874_v23, %s2410_s11 }
 0x12d   : > { %4087 = vst [vmem:[#allocation21_spill] sm:$0xff] %v2885_v15  ;;  %4088 = vst [vmem:[#allocation22_spill] sm:$0xff] %v2887_v17  ;;  %v2900_v16 = vadd.f32 %v2885_v15, %v2877_v61  ;;  %v2906_v37 = vadd.f32 %v2887_v17, %v2883_v47 }
 0x12e   : > { %v513_v27 = vpop.permute.xlu1 %512  ;;  %v511_v39 = vpop.permute.xlu0 %510  ;;  %4093 = vst [vmem:[#allocation27_spill] sm:$0xff] %v2922_v36 }
 0x12f   : > { %4090 = vst [vmem:[#allocation24_spill] sm:$0xff] %v2900_v16  ;;  %4091 = vst [vmem:[#allocation25_spill] sm:$0xff] %v2906_v37  ;;  %v2919_v16 = vsub.f32 %v461_v25, %v2704_v10  ;;  %v2924_v61 = vsub.f32 %v477_v56, %v513_v27  ;;  %v2926_v15 = vsub.f32 %v476_v57, %v511_v39 }
 0x130   : > { %1438 = vrot.lane.b32.xlu1 %v2916_v26, %s2410_s11  ;;  %1440 = vrot.lane.b32.xlu0 %v2912_v50, %s2410_s11  ;;  %v2946_v57 = vadd.f32 %v2763_v34, %v2631_v0  ;;  %v904_v27 = vadd.f32 %v2750_v30, %v2748_v29  ;;  %v903_v39 = vadd.f32 %v2752_v31, %v2744_v28 }
 0x131   : > { %4092 = vst [vmem:[#allocation26_spill] sm:$0xff] %v2919_v16  ;;  %4094 = vst [vmem:[#allocation28_spill] sm:$0xff] %v2924_v61  ;;  %v2934_v19 = vadd.f32 %v2924_v61, %v2919_v16  ;;  %v2940_v22 = vadd.f32 %v2926_v15, %v2922_v36  ;;  %v2962_v34 = vadd.f32 %v2766_v35, %v2639_v2 }
 0x132   : > { %4095 = vst [vmem:[#allocation29_spill] sm:$0xff] %v2926_v15  ;;  %v912_v56 = vrot.slane %v904_v27, 7  ;;  %v911_v16 = vrot.slane %v903_v39, 7  ;;  %v2966_v29 = vadd.f32 %v2839_v52, %v2671_v6  ;;  %v936_v28 = vmul.f32 2.0, %v904_v27 }
 0x133   : > { %4096 = vst [vmem:[#allocation30_spill] sm:$0xff] %v2934_v19  ;;  %4097 = vst [vmem:[#allocation31_spill] sm:$0xff] %v2940_v22  ;;  %v935_v30 = vmul.f32 2.0, %v903_v39  ;;  %v2973_v31 = vadd.f32 %v459_v55, %v2696_v8  ;;  %v2976_v35 = vadd.f32 %v458_v59, %v2698_v9  ;;  %v924_v52 = vrot.slane %v904_v27, 1 }
 0x134   : > { %1238 = vrot.lane.b32.xlu1 %v2946_v57, %s2410_s11  ;;  %1442 = vrot.lane.b32.xlu0 %v2954_v20, %s2410_s11  ;;  %v920_v53 = vsel %vm554_vm1, 0.0, %v912_v56  ;;  %v919_v61 = vsel %vm554_vm1, 0.0, %v911_v16  ;;  %v923_v36 = vrot.slane %v903_v39, 1  ;;  %v2985_v55 = vadd.f32 %v461_v25, %v2704_v10 }
 0x135   : > { %4098 = vst [vmem:[#allocation32_spill] sm:$0xff] %v2976_v35  ;;  %v940_v19 = vadd.f32 %v936_v28, %v920_v53  ;;  %v939_v15 = vadd.f32 %v935_v30, %v919_v61  ;;  %v2988_v59 = vadd.f32 %v460_v51, %v2706_v11  ;;  %v938_v56 = vmul.f32 2.0, %v2772_v44 }
 0x136   : > { %4099 = vst [vmem:[#allocation33_spill] sm:$0xff] %v2985_v55  ;;  %v937_v16 = vmul.f32 2.0, %v2776_v46  ;;  %v932_v27 = vsel %vm567_vm2, %v924_v52, 0.0  ;;  %v931_v39 = vsel %vm567_vm2, %v923_v36, 0.0 }
 0x137   : > { %4100 = vst [vmem:[#allocation34_spill] sm:$0xff] %v2988_v59  ;;  %v944_v28 = vadd.f32 %v940_v19, %v932_v27  ;;  %v943_v25 = vadd.f32 %v939_v15, %v931_v39  ;;  %v942_v30 = vadd.f32 %v938_v56, %v2781_v54  ;;  %v3010_v54 = vsub.f32 %v920_v53, %v932_v27 }
 0x138   : > { %1240 = vrot.lane.b32.xlu1 %v2962_v34, %s2410_s11  ;;  %1444 = vrot.lane.b32.xlu0 %v2966_v29, %s2410_s11  ;;  %v941_v51 = vadd.f32 %v937_v16, %v2787_v58  ;;  %v3012_v58 = vsub.f32 %v919_v61, %v931_v39 }
 0x139   : > { %v946_v44 = vadd.f32 %v942_v30, %v2793_v60  ;;  %4101 = vst [vmem:[#allocation35_spill] sm:$0xff] %v3010_v54 }
 0x13a   : > { %v945_v46 = vadd.f32 %v941_v51, %v2800_v63  ;;  %4102 = vst [vmem:[#allocation36_spill] sm:$0xff] %v3012_v58 }
 0x13c   : > { %1648 = vrot.lane.b32.xlu1 %v2973_v31, %s2410_s11  ;;  %1646 = vrot.lane.b32.xlu0 %v2976_v35, %s2410_s11 }
 0x140   : > { %1652 = vrot.lane.b32.xlu1 %v2985_v55, %s2410_s11  ;;  %1650 = vrot.lane.b32.xlu0 %v2988_v59, %s2410_s11 }
 0x144   : > { %953 = vrot.lane.b32.xlu1 %v944_v28, %s2411_s19  ;;  %951 = vrot.lane.b32.xlu0 %v943_v25, %s2411_s19 }
 0x148   : > { %957 = vrot.lane.b32.xlu1 %v946_v44, %s2411_s19  ;;  %955 = vrot.lane.b32.xlu0 %v945_v46, %s2411_s19 }
 0x14c   : > { %969 = vrot.lane.b32.xlu1 %v944_v28, %s2412_s30  ;;  %967 = vrot.lane.b32.xlu0 %v943_v25, %s2412_s30 }
 0x150   : > { %973 = vrot.lane.b32.xlu1 %v946_v44, %s2412_s30  ;;  %971 = vrot.lane.b32.xlu0 %v945_v46, %s2412_s30 }
 0x154   : > { %997 = vrot.lane.b32.xlu1 %v3010_v54, %s2412_s30  ;;  %995 = vrot.lane.b32.xlu0 %v3012_v58, %s2412_s30 }
 0x166   : > { %v333_v60 = vpop.permute.xlu1 %332  ;;  %v331_v63 = vpop.permute.xlu0 %330 }
 0x167   : > { %v343_v15 = vadd.f32 %v333_v60, %v2641_v3  ;;  %v342_v36 = vadd.f32 %v331_v63, %v2633_v1 }
 0x169   : > { %528 = vrot.lane.b32.xlu1 %v343_v15, %s2409_s4  ;;  %526 = vrot.lane.b32.xlu0 %v342_v36, %s2409_s4 }
 0x16a   : > { %v337_v19 = vpop.permute.xlu1 %336  ;;  %v335_v53 = vpop.permute.xlu0 %334 }
 0x16b   : > { %v3023_v61 = vadd.f32 %v337_v19, %v2639_v2  ;;  %v344_v52 = vadd.f32 %v335_v53, %v2631_v0 }
 0x16d   : > { %532 = vrot.lane.b32.xlu1 %v3023_v61, %s2409_s4  ;;  %530 = vrot.lane.b32.xlu0 %v344_v52, %s2409_s4 }
 0x17e   : > { %v413_v56 = vpop.permute.xlu1 %412  ;;  %v411_v3 = vpop.permute.xlu0 %410 }
 0x17f   : > { %v423_v1 = vadd.f32 %v413_v56, %v2663_v4  ;;  %v422_v16 = vadd.f32 %v411_v3, %v2665_v5 }
 0x181   : > { %696 = vrot.lane.b32.xlu1 %v423_v1, %s2409_s4  ;;  %694 = vrot.lane.b32.xlu0 %v422_v16, %s2409_s4 }
 0x182   : > { %v417_v27 = vpop.permute.xlu1 %416  ;;  %v415_v2 = vpop.permute.xlu0 %414 }
 0x183   : > { %v425_v39 = vadd.f32 %v417_v27, %v2671_v6  ;;  %v424_v0 = vadd.f32 %v415_v2, %v2673_v7 }
 0x185   : > { %700 = vrot.lane.b32.xlu1 %v425_v39, %s2409_s4  ;;  %698 = vrot.lane.b32.xlu0 %v424_v0, %s2409_s4 }
 0x196   : > { %v493_v28 = vpop.permute.xlu1 %492  ;;  %v491_v25 = vpop.permute.xlu0 %490 }
 0x197   : > { %v3038_v4 = vadd.f32 %v493_v28, %v2696_v8  ;;  %v3041_v5 = vadd.f32 %v491_v25, %v2698_v9 }
 0x199   : > { %4103 = vst [vmem:[#allocation37_spill] sm:$0xff] %v3038_v4  ;;  %4104 = vst [vmem:[#allocation38_spill] sm:$0xff] %v3041_v5  ;;  %864 = vrot.lane.b32.xlu1 %v3038_v4, %s2409_s4  ;;  %862 = vrot.lane.b32.xlu0 %v3041_v5, %s2409_s4 }
 0x19a   : > { %v497_v6 = vpop.permute.xlu1 %496  ;;  %v495_v7 = vpop.permute.xlu0 %494 }
 0x19b   : > { %v3048_v30 = vadd.f32 %v497_v6, %v2704_v10  ;;  %v3051_v51 = vadd.f32 %v495_v7, %v2706_v11 }
 0x19d   : > { %4105 = vst [vmem:[#allocation39_spill] sm:$0xff] %v3048_v30  ;;  %4106 = vst [vmem:[#allocation40_spill] sm:$0xff] %v3051_v51  ;;  %868 = vrot.lane.b32.xlu1 %v3048_v30, %s2409_s4  ;;  %866 = vrot.lane.b32.xlu0 %v3051_v51, %s2409_s4 }
 0x19e   : > { %v1235_v8 = vpop.permute.xlu1 %1234  ;;  %v1237_v9 = vpop.permute.xlu0 %1236 }
 0x19f   : > { %v3057_v44 = vsub.f32 %v342_v36, %v1235_v8  ;;  %v1247_v46 = vsub.f32 %v343_v15, %v1237_v9 }
 0x1a1   : > { %v1254_v60 = vrot.slane %v3057_v44, 7  ;;  %v1255_v63 = vrot.slane %v1247_v46, 7  ;;  %v1286_v15 = vmul.f32 2.0, %v3057_v44  ;;  %v1287_v36 = vmul.f32 2.0, %v1247_v46 }
 0x1a2   : > { %v1439_v19 = vpop.permute.xlu1 %1438  ;;  %v1441_v10 = vpop.permute.xlu0 %1440 }
 0x1a3   : > { %v3060_v53 = vsub.f32 %v422_v16, %v1439_v19  ;;  %v1451_v11 = vsub.f32 %v423_v1, %v1441_v10  ;;  %1258 = vrot.lane.b32.xlu0 %v1254_v60, %s2409_s4  ;;  %1260 = vrot.lane.b32.xlu1 %v1255_v63, %s2409_s4  ;;  %v1275_v10 = vrot.slane %v1247_v46, 1 }
 0x1a5   : > { %v1458_v56 = vrot.slane %v3060_v53, 7  ;;  %v1459_v3 = vrot.slane %v1451_v11, 7  ;;  %v1490_v6 = vmul.f32 2.0, %v3060_v53  ;;  %v1491_v7 = vmul.f32 2.0, %v1451_v11 }
 0x1a6   : > { %v1239_v27 = vpop.permute.xlu1 %1238  ;;  %v1443_v2 = vpop.permute.xlu0 %1442 }
 0x1a7   : > { %1462 = vrot.lane.b32.xlu0 %v1458_v56, %s2409_s4  ;;  %1464 = vrot.lane.b32.xlu1 %v1459_v3, %s2409_s4  ;;  %v1248_v1 = vsub.f32 %v344_v52, %v1239_v27  ;;  %v1452_v16 = vsub.f32 %v424_v0, %v1443_v2  ;;  %v1283_v2 = vsel %vm567_vm2, %v1275_v10, 0.0 }
 0x1a9   : > { %v1256_v9 = vrot.slane %v1248_v1, 7  ;;  %v1460_v60 = vrot.slane %v1452_v16, 7  ;;  %v1288_v52 = vmul.f32 2.0, %v1248_v1  ;;  %v1492_v27 = vmul.f32 2.0, %v1452_v16 }
 0x1aa   : > { %v1241_v28 = vpop.permute.xlu1 %1240  ;;  %v1445_v25 = vpop.permute.xlu0 %1444 }
 0x1ab   : > { %1294 = vrot.lane.b32.xlu0 %v1286_v15, %s2409_s4  ;;  %1296 = vrot.lane.b32.xlu1 %v1287_v36, %s2409_s4  ;;  %v1453_v8 = vsub.f32 %v425_v39, %v1445_v25  ;;  %v1249_v56 = vsub.f32 %v3023_v61, %v1241_v28  ;;  %v1479_v15 = vrot.slane %v1451_v11, 1  ;;  %v1276_v25 = vrot.slane %v1248_v1, 1 }
 0x1ac   : > { %v1480_v11 = vrot.slane %v1452_v16, 1 }
 0x1ad   : > { %v1461_v0 = vrot.slane %v1453_v8, 7  ;;  %v1257_v36 = vrot.slane %v1249_v56, 7  ;;  %v1487_v46 = vsel %vm567_vm2, %v1479_v15, 0.0  ;;  %v1289_v61 = vmul.f32 2.0, %v1249_v56 }
 0x1ae   : > { %v3073_v63 = vpop.permute.xlu1 %1648  ;;  %v3075_v19 = vpop.permute.xlu0 %1646  ;;  %v1284_v28 = vsel %vm567_vm2, %v1276_v25, 0.0  ;;  %v1277_v10 = vrot.slane %v1249_v56, 1  ;;  %v1481_v15 = vrot.slane %v1453_v8, 1 }
 0x1af   : > { %1498 = vrot.lane.b32.xlu0 %v1490_v6, %s2409_s4  ;;  %1500 = vrot.lane.b32.xlu1 %v1491_v7, %s2409_s4  ;;  %4107 = vst [vmem:[#allocation41_spill] sm:$0xff] %v3073_v63  ;;  %4108 = vst [vmem:[#allocation42_spill] sm:$0xff] %v3075_v19 }
 0x1b0   : > { %v1489_v56 = vsel %vm567_vm2, %v1481_v15, 0.0 }
 0x1b2   : > { %v3082_v39 = vpop.permute.xlu1 %1652  ;;  %v3084_v3 = vpop.permute.xlu0 %1650 }
 0x1b3   : > { %1262 = vrot.lane.b32.xlu0 %v1256_v9, %s2409_s4  ;;  %1466 = vrot.lane.b32.xlu1 %v1460_v60, %s2409_s4  ;;  %4109 = vst [vmem:[#allocation43_spill] sm:$0xff] %v3082_v39  ;;  %4110 = vst [vmem:[#allocation44_spill] sm:$0xff] %v3084_v3  ;;  %v1493_v9 = vmul.f32 2.0, %v1453_v8 }
 0x1b6   : > { %v3090_v6 = vpop.permute.xlu1 %953  ;;  %v3092_v7 = vpop.permute.xlu0 %951 }
 0x1b7   : > { %1298 = vrot.lane.b32.xlu0 %v1288_v52, %s2409_s4  ;;  %1468 = vrot.lane.b32.xlu1 %v1461_v0, %s2409_s4  ;;  %4111 = vst [vmem:[#allocation45_spill] sm:$0xff] %v3090_v6  ;;  %4112 = vst [vmem:[#allocation46_spill] sm:$0xff] %v3092_v7  ;;  %v1488_v52 = vsel %vm567_vm2, %v1480_v11, 0.0  ;;  %v1274_v0 = vrot.slane %v3057_v44, 1 }
 0x1b9   : > { %v1282_v16 = vsel %vm567_vm2, %v1274_v0, 0.0 }
 0x1ba   : > { %v3099_v60 = vpop.permute.xlu1 %957  ;;  %v3101_v1 = vpop.permute.xlu0 %955 }
 0x1bb   : > { %1502 = vrot.lane.b32.xlu0 %v1492_v27, %s2409_s4  ;;  %1316 = vrot.lane.b32.xlu1 %v1283_v2, %s2409_s4  ;;  %4113 = vst [vmem:[#allocation47_spill] sm:$0xff] %v3099_v60  ;;  %4114 = vst [vmem:[#allocation48_spill] sm:$0xff] %v3101_v1  ;;  %v1285_v27 = vsel %vm567_vm2, %v1277_v10, 0.0  ;;  %v1478_v2 = vrot.slane %v3060_v53, 1 }
 0x1bd   : > { %v1486_v44 = vsel %vm567_vm2, %v1478_v2, 0.0 }
 0x1bf   : > { %1264 = vrot.lane.b32.xlu0 %v1257_v36, %s2409_s4  ;;  %1520 = vrot.lane.b32.xlu1 %v1487_v46, %s2409_s4  ;;  %v3110_v36 = vpop.permute.xlu1 %969  ;;  %v3112_v46 = vpop.permute.xlu0 %967 }
 0x1c0   : > { %4115 = vst [vmem:[#allocation49_spill] sm:$0xff] %v3110_v36  ;;  %4116 = vst [vmem:[#allocation50_spill] sm:$0xff] %v3112_v46 }
 0x1c3   : > { %1300 = vrot.lane.b32.xlu0 %v1289_v61, %s2409_s4  ;;  %1318 = vrot.lane.b32.xlu1 %v1284_v28, %s2409_s4  ;;  %v3120_v25 = vpop.permute.xlu1 %973  ;;  %v3122_v53 = vpop.permute.xlu0 %971 }
 0x1c4   : > { %4117 = vst [vmem:[#allocation51_spill] sm:$0xff] %v3120_v25  ;;  %4118 = vst [vmem:[#allocation52_spill] sm:$0xff] %v3122_v53 }
 0x1c7   : > { %1504 = vrot.lane.b32.xlu0 %v1493_v9, %s2409_s4  ;;  %1522 = vrot.lane.b32.xlu1 %v1488_v52, %s2409_s4  ;;  %v3124_v8 = vpop.permute.xlu1 %997  ;;  %v3126_v61 = vpop.permute.xlu0 %995 }
 0x1c8   : > { %4119 = vst [vmem:[#allocation53_spill] sm:$0xff] %v3124_v8  ;;  %4120 = vst [vmem:[#allocation54_spill] sm:$0xff] %v3126_v61 }
 0x1cb   : > { %1314 = vrot.lane.b32.xlu0 %v1282_v16, %s2409_s4  ;;  %1320 = vrot.lane.b32.xlu1 %v1285_v27, %s2409_s4 }
 0x1cf   : > { %1518 = vrot.lane.b32.xlu0 %v1486_v44, %s2409_s4  ;;  %1524 = vrot.lane.b32.xlu1 %v1489_v56, %s2409_s4 }
 0x1db   : > { %v529_v28 = vpop.permute.xlu1 %528  ;;  %v527_v11 = vpop.permute.xlu0 %526 }
 0x1dc   : > { %v539_v9 = vadd.f32 %v529_v28, %v2874_v23  ;;  %v538_v52 = vadd.f32 %v527_v11, %v2870_v18 }
 0x1de   : > { %v547_v0 = vrot.slane %v539_v9, 7  ;;  %v560_v10 = vrot.slane %v539_v9, 1  ;;  %v573_v16 = vmul.f32 2.0, %v539_v9  ;;  %v546_v27 = vrot.slane %v538_v52, 7 }
 0x1df   : > { %v559_v2 = vrot.slane %v538_v52, 1  ;;  %v572_v15 = vmul.f32 2.0, %v538_v52  ;;  %v533_v44 = vpop.permute.xlu1 %532  ;;  %v531_v56 = vpop.permute.xlu0 %530 }
 0x1e0   : > { %v556_v60 = vsel %vm554_vm1, 0.0, %v547_v0  ;;  %v569_v25 = vsel %vm567_vm2, %v560_v10, 0.0  ;;  %v555_v22 = vsel %vm554_vm1, 0.0, %v546_v27  ;;  %v541_v47 = vadd.f32 %v533_v44, %v2962_v34 }
 0x1e1   : > { %v577_v17 = vadd.f32 %v573_v16, %v556_v60  ;;  %v568_v23 = vsel %vm567_vm2, %v559_v2, 0.0  ;;  %v576_v18 = vadd.f32 %v572_v15, %v555_v22  ;;  %v540_v28 = vadd.f32 %v531_v56, %v2946_v57 }
 0x1e2   : > { %v549_v11 = vrot.slane %v541_v47, 7  ;;  %v562_v9 = vrot.slane %v541_v47, 1  ;;  %v575_v1 = vmul.f32 2.0, %v541_v47  ;;  %v3136_v52 = vsub.f32 %v556_v60, %v569_v25 }
 0x1e3   : > { %v548_v53 = vrot.slane %v540_v28, 7  ;;  %v561_v30 = vrot.slane %v540_v28, 1  ;;  %v574_v0 = vmul.f32 2.0, %v540_v28  ;;  %v3138_v39 = vsub.f32 %v555_v22, %v568_v23 }
 0x1e4   : > { %v558_v10 = vsel %vm554_vm1, 0.0, %v549_v11  ;;  %v571_v34 = vsel %vm567_vm2, %v562_v9, 0.0  ;;  %636 = vrot.lane.b32.xlu1 %v3136_v52, %s2412_s30  ;;  %v3144_v16 = vadd.f32 %v577_v17, %v569_v25  ;;  %v3154_v15 = vadd.f32 %v576_v18, %v568_v23 }
 0x1e5   : > { %v579_v57 = vadd.f32 %v575_v1, %v558_v10  ;;  %v557_v27 = vsel %vm554_vm1, 0.0, %v548_v53  ;;  %v570_v47 = vsel %vm567_vm2, %v561_v30, 0.0  ;;  %634 = vrot.lane.b32.xlu0 %v3138_v39, %s2412_s30  ;;  %v3150_v60 = vsub.f32 %v558_v10, %v571_v34 }
 0x1e6   : > { %v578_v22 = vadd.f32 %v574_v0, %v557_v27  ;;  %v3152_v2 = vsub.f32 %v557_v27, %v570_v47 }
 0x1e7   : > { %v3156_v44 = vadd.f32 %v579_v57, %v571_v34 }
 0x1e8   : > { %640 = vrot.lane.b32.xlu1 %v3150_v60, %s2412_s30  ;;  %v3160_v17 = vadd.f32 %v578_v22, %v570_v47 }
 0x1e9   : > { %638 = vrot.lane.b32.xlu0 %v3152_v2, %s2412_s30 }
 0x1ec   : > { %660 = vrot.lane.b32.xlu1 %v3136_v52, %s2411_s19 }
 0x1ed   : > { %658 = vrot.lane.b32.xlu0 %v3138_v39, %s2411_s19 }
 0x1f0   : > { %664 = vrot.lane.b32.xlu1 %v3150_v60, %s2411_s19 }
 0x1f1   : > { %662 = vrot.lane.b32.xlu0 %v3152_v2, %s2411_s19 }
 0x1f3   : > { %v697_v30 = vpop.permute.xlu1 %696  ;;  %v695_v1 = vpop.permute.xlu0 %694 }
 0x1f4   : > { %v707_v25 = vadd.f32 %v697_v30, %v2912_v50  ;;  %v706_v53 = vadd.f32 %v695_v1, %v2916_v26 }
 0x1f6   : > { %v715_v56 = vrot.slane %v707_v25, 7  ;;  %v727_v23 = vrot.slane %v707_v25, 1  ;;  %v739_v18 = vmul.f32 2.0, %v707_v25  ;;  %v714_v28 = vrot.slane %v706_v53, 7 }
 0x1f7   : > { %v726_v11 = vrot.slane %v706_v53, 1  ;;  %v738_v9 = vmul.f32 2.0, %v706_v53  ;;  %v701_v0 = vpop.permute.xlu1 %700  ;;  %v699_v10 = vpop.permute.xlu0 %698 }
 0x1f8   : > { %v723_v34 = vsel %vm554_vm1, 0.0, %v715_v56  ;;  %v735_v57 = vsel %vm567_vm2, %v727_v23, 0.0  ;;  %v722_v27 = vsel %vm554_vm1, 0.0, %v714_v28  ;;  %v709_v47 = vadd.f32 %v701_v0, %v2966_v29 }
 0x1f9   : > { %v743_v22 = vadd.f32 %v739_v18, %v723_v34  ;;  %v734_v50 = vsel %vm567_vm2, %v726_v11, 0.0  ;;  %v742_v26 = vadd.f32 %v738_v9, %v722_v27  ;;  %v708_v30 = vadd.f32 %v699_v10, %v2954_v20 }
 0x1fa   : > { %v717_v1 = vrot.slane %v709_v47, 7  ;;  %v729_v25 = vrot.slane %v709_v47, 1  ;;  %v741_v51 = vmul.f32 2.0, %v709_v47  ;;  %v3180_v53 = vsub.f32 %v723_v34, %v735_v57 }
 0x1fb   : > { %v716_v3 = vrot.slane %v708_v30, 7  ;;  %v728_v4 = vrot.slane %v708_v30, 1  ;;  %v740_v56 = vmul.f32 2.0, %v708_v30  ;;  %v3182_v63 = vsub.f32 %v722_v27, %v734_v50 }
 0x1fc   : > { %v725_v23 = vsel %vm554_vm1, 0.0, %v717_v1  ;;  %v737_v29 = vsel %vm567_vm2, %v729_v25, 0.0  ;;  %800 = vrot.lane.b32.xlu1 %v3180_v53, %s2412_s30  ;;  %v3188_v18 = vadd.f32 %v743_v22, %v735_v57  ;;  %v3198_v34 = vadd.f32 %v742_v26, %v734_v50 }
 0x1fd   : > { %v745_v20 = vadd.f32 %v741_v51, %v725_v23  ;;  %v724_v28 = vsel %vm554_vm1, 0.0, %v716_v3  ;;  %v736_v11 = vsel %vm567_vm2, %v728_v4, 0.0  ;;  %798 = vrot.lane.b32.xlu0 %v3182_v63, %s2412_s30  ;;  %v3194_v9 = vsub.f32 %v725_v23, %v737_v29 }
 0x1fe   : > { %v744_v0 = vadd.f32 %v740_v56, %v724_v28  ;;  %v3196_v10 = vsub.f32 %v724_v28, %v736_v11 }
 0x1ff   : > { %v3200_v27 = vadd.f32 %v745_v20, %v737_v29 }
 0x200   : > { %804 = vrot.lane.b32.xlu1 %v3194_v9, %s2412_s30  ;;  %v3204_v51 = vadd.f32 %v744_v0, %v736_v11 }
 0x201   : > { %802 = vrot.lane.b32.xlu0 %v3196_v10, %s2412_s30 }
 0x204   : > { %824 = vrot.lane.b32.xlu1 %v3180_v53, %s2411_s19 }
 0x205   : > { %822 = vrot.lane.b32.xlu0 %v3182_v63, %s2411_s19 }
 0x208   : > { %828 = vrot.lane.b32.xlu1 %v3194_v9, %s2411_s19 }
 0x209   : > { %826 = vrot.lane.b32.xlu0 %v3196_v10, %s2411_s19 }
 0x20b   : > { %v3216_v4 = vpop.permute.xlu1 %864  ;;  %v3218_v3 = vpop.permute.xlu0 %862 }
 0x20c   : > { %4121 = vst [vmem:[#allocation55_spill] sm:$0xff] %v3216_v4  ;;  %4122 = vst [vmem:[#allocation56_spill] sm:$0xff] %v3218_v3 }
 0x20f   : > { %v3220_v57 = vpop.permute.xlu1 %868  ;;  %v3222_v47 = vpop.permute.xlu0 %866 }
 0x210   : > { %4123 = vst [vmem:[#allocation57_spill] sm:$0xff] %v3220_v57  ;;  %4124 = vst [vmem:[#allocation58_spill] sm:$0xff] %v3222_v47 }
 0x215   : > { %v1261_v22 = vpop.permute.xlu1 %1260  ;;  %v1259_v50 = vpop.permute.xlu0 %1258 }
 0x216   : > { %v1271_v0 = vsel %vm554_vm1, 0.0, %v1261_v22  ;;  %v1270_v45 = vsel %vm554_vm1, 0.0, %v1259_v50 }
 0x219   : > { %v1465_v26 = vpop.permute.xlu1 %1464  ;;  %v1463_v30 = vpop.permute.xlu0 %1462 }
 0x21a   : > { %v3242_v6 = vsel %vm554_vm1, 0.0, %v1465_v26  ;;  %v1474_v49 = vsel %vm554_vm1, 0.0, %v1463_v30 }
 0x21d   : > { %v3224_v1 = vpop.permute.xlu1 %1296  ;;  %v3226_v25 = vpop.permute.xlu0 %1294 }
 0x221   : > { %v3228_v56 = vpop.permute.xlu1 %1500  ;;  %v3230_v23 = vpop.permute.xlu0 %1498 }
 0x225   : > { %v1467_v29 = vpop.permute.xlu1 %1466  ;;  %v1263_v20 = vpop.permute.xlu0 %1262 }
 0x226   : > { %v1476_v47 = vsel %vm554_vm1, 0.0, %v1467_v29  ;;  %v1272_v55 = vsel %vm554_vm1, 0.0, %v1263_v20 }
 0x229   : > { %v1469_v28 = vpop.permute.xlu1 %1468  ;;  %v3232_v11 = vpop.permute.xlu0 %1298 }
 0x22a   : > { %v1477_v20 = vsel %vm554_vm1, 0.0, %v1469_v28 }
 0x22d   : > { %v1317_v5 = vpop.permute.xlu1 %1316  ;;  %v3235_v19 = vpop.permute.xlu0 %1502 }
 0x22e   : > { %v3237_v37 = vsub.f32 %v1271_v0, %v1317_v5 }
 0x230   : > { %4125 = vst [vmem:[#allocation59_spill] sm:$0xff] %v3237_v37  ;;  %1380 = vrot.lane.b32.xlu1 %v3237_v37, %s2412_s30 }
 0x231   : > { %v3244_v36 = vpop.permute.xlu1 %1520  ;;  %v1265_v8 = vpop.permute.xlu0 %1264 }
 0x232   : > { %v3248_v7 = vsub.f32 %v3242_v6, %v3244_v36  ;;  %v1273_v3 = vsel %vm554_vm1, 0.0, %v1265_v8  ;;  %v1307_v8 = vadd.f32 %v3224_v1, %v1271_v0  ;;  %v1512_v1 = vadd.f32 %v3235_v19, %v1476_v47 }
 0x234   : > { %1584 = vrot.lane.b32.xlu1 %v3248_v7, %s2412_s30 }
 0x235   : > { %v3252_v22 = vpop.permute.xlu0 %1300  ;;  %v3254_v46 = vpop.permute.xlu1 %1318 }
 0x239   : > { %v3256_v61 = vpop.permute.xlu0 %1504  ;;  %v3261_v13 = vpop.permute.xlu1 %1522 }
 0x23a   : > { %v3270_v57 = vsub.f32 %v1476_v47, %v3261_v13  ;;  %v1513_v19 = vadd.f32 %v3256_v61, %v1477_v20  ;;  %v1084_v61 = vmul.f32 2.0, %v2827_v40 }
 0x23d   : > { %v1315_v26 = vpop.permute.xlu0 %1314  ;;  %v1321_v30 = vpop.permute.xlu1 %1320 }
 0x23e   : > { %v3259_v24 = vsub.f32 %v1270_v45, %v1315_v26  ;;  %v3296_v35 = vsub.f32 %v1273_v3, %v1321_v30 }
 0x240   : > { %4126 = vst [vmem:[#allocation60_spill] sm:$0xff] %v3259_v24  ;;  %1402 = vrot.lane.b32.xlu1 %v3259_v24, %s2411_s19  ;;  %1378 = vrot.lane.b32.xlu0 %v3259_v24, %s2412_s30  ;;  %v3280_v24 = vsub.f32 %v1272_v55, %v3254_v46 }
 0x241   : > { %v1519_v59 = vpop.permute.xlu0 %1518  ;;  %v1525_v29 = vpop.permute.xlu1 %1524 }
 0x242   : > { %v3272_v50 = vsub.f32 %v1474_v49, %v1519_v59  ;;  %v3298_v4 = vsub.f32 %v1477_v20, %v1525_v29  ;;  %v1533_v47 = vadd.f32 %v1525_v29, %v1513_v19  ;;  %v1059_v20 = vrot.slane %v2831_v42, 7 }
 0x244   : > { %4127 = vst [vmem:[#allocation61_spill] sm:$0xff] %v3272_v50  ;;  %1586 = vrot.lane.b32.xlu1 %v3270_v57, %s2412_s30  ;;  %1582 = vrot.lane.b32.xlu0 %v3272_v50, %s2412_s30 }
 0x248   : > { %1608 = vrot.lane.b32.xlu1 %v3248_v7, %s2411_s19  ;;  %1382 = vrot.lane.b32.xlu0 %v3280_v24, %s2412_s30 }
 0x24c   : > { %1406 = vrot.lane.b32.xlu1 %v3280_v24, %s2411_s19  ;;  %1404 = vrot.lane.b32.xlu0 %v3237_v37, %s2411_s19 }
 0x250   : > { %1610 = vrot.lane.b32.xlu1 %v3270_v57, %s2411_s19  ;;  %1606 = vrot.lane.b32.xlu0 %v3272_v50, %s2411_s19 }
 0x254   : > { %1612 = vrot.lane.b32.xlu1 %v3298_v4, %s2411_s19  ;;  %1384 = vrot.lane.b32.xlu0 %v3296_v35, %s2412_s30 }
 0x258   : > { %590 = vrot.lane.b32.xlu1 %v3144_v16, %s2411_s19  ;;  %1588 = vrot.lane.b32.xlu0 %v3298_v4, %s2412_s30 }
 0x25c   : > { %594 = vrot.lane.b32.xlu1 %v3156_v44, %s2411_s19  ;;  %1408 = vrot.lane.b32.xlu0 %v3296_v35, %s2411_s19 }
 0x260   : > { %607 = vrot.lane.b32.xlu1 %v3144_v16, %s2412_s30  ;;  %588 = vrot.lane.b32.xlu0 %v3154_v15, %s2411_s19  ;;  %v1327_v16 = vadd.f32 %v1317_v5, %v1307_v8 }
 0x264   : > { %611 = vrot.lane.b32.xlu1 %v3156_v44, %s2412_s30  ;;  %592 = vrot.lane.b32.xlu0 %v3160_v17, %s2411_s19  ;;  %v1510_v44 = vadd.f32 %v3230_v23, %v1474_v49  ;;  %v1308_v49 = vadd.f32 %v3232_v11, %v1272_v55  ;;  %v1532_v55 = vadd.f32 %v3261_v13, %v1512_v1  ;;  %v1863_v1 = vrot.slane %v2829_v41, 7 }
 0x268   : > { %756 = vrot.lane.b32.xlu1 %v3188_v18, %s2411_s19  ;;  %605 = vrot.lane.b32.xlu0 %v3154_v15, %s2412_s30  ;;  %v1306_v15 = vadd.f32 %v3226_v25, %v1270_v45  ;;  %v1511_v45 = vadd.f32 %v3228_v56, %v3242_v6  ;;  %v1309_v6 = vadd.f32 %v3252_v22, %v1273_v3  ;;  %v1060_v3 = vrot.slane %v2827_v40, 7 }
 0x26a   : > { %v1068_v0 = vsel %vm554_vm1, 0.0, %v1060_v3 }
 0x26b   : > { %v1088_v29 = vadd.f32 %v1084_v61, %v1068_v0 }
 0x26c   : > { %760 = vrot.lane.b32.xlu1 %v3200_v27, %s2411_s19  ;;  %609 = vrot.lane.b32.xlu0 %v3160_v17, %s2412_s30  ;;  %v3342_v17 = vpop.permute.xlu1 %636 }
 0x270   : > { %772 = vrot.lane.b32.xlu1 %v3188_v18, %s2412_s30  ;;  %754 = vrot.lane.b32.xlu0 %v3198_v34, %s2411_s19  ;;  %v1326_v18 = vadd.f32 %v1315_v26, %v1306_v15  ;;  %v3349_v5 = vpop.permute.xlu1 %640  ;;  %v1072_v26 = vrot.slane %v2827_v40, 1  ;;  %v1715_v40 = vrot.slane %v2756_v32, 7 }
 0x272   : > { %v1080_v8 = vsel %vm567_vm2, %v1072_v26, 0.0  ;;  %v1726_v26 = vrot.slane %v2760_v33, 1 }
 0x274   : > { %776 = vrot.lane.b32.xlu1 %v3200_v27, %s2412_s30  ;;  %758 = vrot.lane.b32.xlu0 %v3204_v51, %s2411_s19  ;;  %v1530_v27 = vadd.f32 %v1519_v59, %v1510_v44  ;;  %v3358_v59 = vpop.permute.xlu0 %634  ;;  %v3361_v25 = vpop.permute.xlu1 %660  ;;  %v1092_v44 = vadd.f32 %v1088_v29, %v1080_v8  ;;  %v3444_v29 = vsel %vm554_vm1, 0.0, %v1863_v1 }
 0x278   : > { %1336 = vrot.lane.b32.xlu1 %v1327_v16, %s2411_s19  ;;  %770 = vrot.lane.b32.xlu0 %v3198_v34, %s2412_s30  ;;  %v1531_v34 = vadd.f32 %v3244_v36, %v1511_v45  ;;  %v3367_v56 = vpop.permute.xlu0 %638  ;;  %v1329_v36 = vadd.f32 %v1321_v30, %v1309_v6  ;;  %v3423_v6 = vsel %vm554_vm1, 0.0, %v1715_v40 }
 0x27c   : > { %1352 = vrot.lane.b32.xlu1 %v1327_v16, %s2412_s30  ;;  %774 = vrot.lane.b32.xlu0 %v3204_v51, %s2412_s30  ;;  %v1328_v51 = vadd.f32 %v3254_v46, %v1308_v49  ;;  %v3371_v46 = vpop.permute.xlu1 %664  ;;  %v3376_v23 = vpop.permute.xlu0 %658  ;;  %v1083_v16 = vmul.f32 2.0, %v2831_v42  ;;  %v1071_v49 = vrot.slane %v2831_v42, 1 }
 0x27e   : > { %v1079_v42 = vsel %vm567_vm2, %v1071_v49, 0.0  ;;  %v1862_v49 = vrot.slane %v2833_v43, 7 }
 0x280   : > { %1538 = vrot.lane.b32.xlu1 %v1530_v27, %s2411_s19  ;;  %1334 = vrot.lane.b32.xlu0 %v1326_v18, %s2411_s19  ;;  %v3378_v13 = vpop.permute.xlu1 %800  ;;  %v3383_v28 = vpop.permute.xlu0 %662 }
 0x284   : > { %1554 = vrot.lane.b32.xlu1 %v1530_v27, %s2412_s30  ;;  %1350 = vrot.lane.b32.xlu0 %v1326_v18, %s2412_s30  ;;  %v3385_v11 = vpop.permute.xlu1 %804  ;;  %v3392_v22 = vpop.permute.xlu0 %798  ;;  %v1727_v18 = vrot.slane %v2756_v32, 1  ;;  %v1067_v27 = vsel %vm554_vm1, 0.0, %v1059_v20 }
 0x288   : > { %1354 = vrot.lane.b32.xlu1 %v1328_v51, %s2412_s30  ;;  %1540 = vrot.lane.b32.xlu0 %v1531_v34, %s2411_s19  ;;  %v3398_v30 = vpop.permute.xlu1 %824  ;;  %v3407_v15 = vpop.permute.xlu0 %802 }
 0x28c   : > { %1558 = vrot.lane.b32.xlu1 %v1532_v55, %s2412_s30  ;;  %1556 = vrot.lane.b32.xlu0 %v1531_v34, %s2412_s30  ;;  %v3412_v45 = vpop.permute.xlu1 %828  ;;  %v3418_v34 = vsub.f32 %v1068_v0, %v1080_v8  ;;  %v3428_v19 = vpop.permute.xlu0 %822  ;;  %v1714_v0 = vrot.slane %v2760_v33, 7 }
 0x28e   : > { %v1722_v1 = vsel %vm554_vm1, 0.0, %v1714_v0 }
 0x290   : > { %1356 = vrot.lane.b32.xlu1 %v1329_v36, %s2412_s30  ;;  %1338 = vrot.lane.b32.xlu0 %v1328_v51, %s2411_s19  ;;  %v1087_v51 = vadd.f32 %v1083_v16, %v1067_v27  ;;  %v3452_v8 = vpop.permute.xlu0 %826 }
 0x292   : > { %v1091_v61 = vadd.f32 %v1087_v51, %v1079_v42  ;;  %v1874_v51 = vrot.slane %v2833_v43, 1 }
 0x294   : > { %1544 = vrot.lane.b32.xlu1 %v1533_v47, %s2411_s19  ;;  %1542 = vrot.lane.b32.xlu0 %v1532_v55, %s2411_s19  ;;  %v1875_v55 = vrot.slane %v2829_v41, 1  ;;  %v3479_v0 = vsel %vm567_vm2, %v1874_v51, 0.0 }
 0x296   : > { %v3447_v20 = vsel %vm567_vm2, %v1875_v55, 0.0  ;;  %v1734_v55 = vsel %vm567_vm2, %v1726_v26, 0.0 }
 0x297   : > { %v3456_v40 = vsub.f32 %v3444_v29, %v3447_v20 }
 0x298   : > { %1001 = vrot.lane.b32.xlu1 %v2797_v62, %s2412_s30  ;;  %1340 = vrot.lane.b32.xlu0 %v1329_v36, %s2411_s19  ;;  %v3426_v36 = vsel %vm567_vm2, %v1727_v18, 0.0  ;;  %v3458_v18 = vsub.f32 %v1067_v27, %v1079_v42  ;;  %v3473_v42 = vsub.f32 %v1722_v1, %v1734_v55 }
 0x299   : > { %v3439_v3 = vsub.f32 %v3423_v6, %v3426_v36  ;;  %4130 = vst [vmem:[#allocation64_spill] sm:$0xff] %v3456_v40 }
 0x29a   : > { %4131 = vst [vmem:[#allocation65_spill] sm:$0xff] %v3458_v18  ;;  %4133 = vst [vmem:[#allocation67_spill] sm:$0xff] %v3473_v42 }
 0x29b   : > { %4129 = vst [vmem:[#allocation63_spill] sm:$0xff] %v3439_v3 }
 0x29c   : > { %1021 = vrot.lane.b32.xlu1 %v3010_v54, %s2411_s19  ;;  %1560 = vrot.lane.b32.xlu0 %v1533_v47, %s2412_s30  ;;  %v1738_v54 = vmul.f32 2.0, %v2760_v33 }
 0x2a0   : > { %1025 = vrot.lane.b32.xlu1 %v2797_v62, %s2411_s19  ;;  %999 = vrot.lane.b32.xlu0 %v2804_v14, %s2412_s30  ;;  %v1742_v62 = vadd.f32 %v1738_v54, %v1722_v1 }
 0x2a2   : > { %v3430_v47 = vpop.permute.xlu1 %1380  ;;  %v1746_v50 = vadd.f32 %v1742_v62, %v1734_v55  ;;  %v3508_v62 = vsub.f32 %v2859_v48, %v2880_v12  ;;  %v3523_v48 = vsub.f32 %v2817_v21, %v2824_v38 }
 0x2a3   : > { %4128 = vst [vmem:[#allocation62_spill] sm:$0xff] %v3430_v47  ;;  %v1599_v47 = vmul.f32 2.0, %v3248_v7  ;;  %v1739_v7 = vmul.f32 2.0, %v2756_v32  ;;  %v1887_v32 = vmul.f32 2.0, %v2829_v41 }
 0x2a4   : > { %1101 = vrot.lane.b32.xlu1 %v1092_v44, %s2411_s19  ;;  %1019 = vrot.lane.b32.xlu0 %v3012_v58, %s2411_s19 }
 0x2a5   : > { %v1743_v12 = vadd.f32 %v1739_v7, %v3423_v6  ;;  %v1891_v21 = vadd.f32 %v1887_v32, %v3444_v29  ;;  %v1601_v7 = vmul.f32 2.0, %v3298_v4 }
 0x2a6   : > { %v1585_v16 = vpop.permute.xlu1 %1584 }
 0x2a8   : > { %1145 = vrot.lane.b32.xlu1 %v3418_v34, %s2412_s30  ;;  %1023 = vrot.lane.b32.xlu0 %v2804_v14, %s2411_s19  ;;  %v3476_v14 = vsel %vm554_vm1, 0.0, %v1862_v49  ;;  %v1595_v49 = vsel %vm617_vm3, 0.0, %v1585_v16  ;;  %v1396_v16 = vmul.f32 2.0, %v3280_v24  ;;  %v1600_v24 = vmul.f32 2.0, %v3270_v57 }
 0x2ac   : > { %1800 = vrot.lane.b32.xlu1 %v3439_v3, %s2412_s30  ;;  %1099 = vrot.lane.b32.xlu0 %v1091_v61, %s2411_s19 }
 0x2b0   : > { %1948 = vrot.lane.b32.xlu1 %v3456_v40, %s2412_s30  ;;  %1143 = vrot.lane.b32.xlu0 %v3458_v18, %s2412_s30  ;;  %v3488_v40 = vsub.f32 %v3476_v14, %v3479_v0 }
 0x2b2   : > { %v3469_v58 = vpop.permute.xlu1 %1402  ;;  %v3471_v27 = vpop.permute.xlu0 %1378 }
 0x2b3   : > { %4132 = vst [vmem:[#allocation66_spill] sm:$0xff] %v3469_v58 }
 0x2b4   : > { %1117 = vrot.lane.b32.xlu1 %v1092_v44, %s2412_s30  ;;  %1798 = vrot.lane.b32.xlu0 %v3473_v42, %s2412_s30  ;;  %v1603_v44 = vadd.f32 %v1599_v47, %v1595_v49 }
 0x2b6   : > { %v1587_v26 = vpop.permute.xlu1 %1586  ;;  %v3484_v33 = vpop.permute.xlu0 %1582 }
 0x2b7   : > { %4134 = vst [vmem:[#allocation68_spill] sm:$0xff] %v3484_v33 }
 0x2b8   : > { %1167 = vrot.lane.b32.xlu1 %v3458_v18, %s2411_s19  ;;  %1946 = vrot.lane.b32.xlu0 %v3488_v40, %s2412_s30 }
 0x2ba   : > { %v1609_v51 = vpop.permute.xlu1 %1608  ;;  %v1383_v58 = vpop.permute.xlu0 %1382 }
 0x2bb   : > { %v1619_v37 = vsel %vm600_vm4, %v1609_v51, 0.0  ;;  %v1392_v33 = vsel %vm617_vm3, 0.0, %v1383_v58  ;;  %v1596_v58 = vsel %vm617_vm3, 0.0, %v1587_v26  ;;  %v1886_v51 = vmul.f32 2.0, %v2833_v43 }
 0x2bc   : > { %v3498_v54 = vadd.f32 %v1619_v37, %v1603_v44  ;;  %1754 = vrot.lane.b32.xlu1 %v1746_v50, %s2411_s19  ;;  %1115 = vrot.lane.b32.xlu0 %v1091_v61, %s2412_s30  ;;  %v1400_v1 = vadd.f32 %v1396_v16, %v1392_v33  ;;  %v1604_v61 = vadd.f32 %v1600_v24, %v1596_v58 }
 0x2bd   : > { %v1747_v44 = vadd.f32 %v1743_v12, %v3426_v36  ;;  %v1890_v4 = vadd.f32 %v1886_v51, %v3476_v14  ;;  %v651_v14 = vmul.f32 2.0, %v3136_v52  ;;  %v647_v51 = vsel %vm617_vm3, 0.0, %v3342_v17  ;;  %v4137_v17 = vld [vmem:[#allocation56_spill] sm:$0xff] }
 0x2be   : > { %v1407_v18 = vpop.permute.xlu1 %1406  ;;  %v3504_v47 = vpop.permute.xlu0 %1404  ;;  %v646_v52 = vsel %vm617_vm3, 0.0, %v3358_v59  ;;  %v671_v59 = vsel %vm600_vm4, %v3361_v25, 0.0  ;;  %v670_v25 = vsel %vm600_vm4, %v3376_v23, 0.0 }
 0x2bf   : > { %v1416_v37 = vsel %vm600_vm4, %v1407_v18, 0.0  ;;  %v3561_v12 = vadd.f32 %v1890_v4, %v3479_v0  ;;  %v814_v0 = vmul.f32 2.0, %v3182_v63  ;;  %v811_v63 = vsel %vm617_vm3, 0.0, %v3378_v13 }
 0x2c0   : > { %v3513_v55 = vadd.f32 %v1416_v37, %v1400_v1  ;;  %1770 = vrot.lane.b32.xlu1 %v1746_v50, %s2412_s30  ;;  %1147 = vrot.lane.b32.xlu0 %v3508_v62, %s2412_s30  ;;  %v1397_v50 = vmul.f32 2.0, %v3296_v35  ;;  %v3543_v35 = vadd.f32 %v1891_v21, %v3447_v20  ;;  %v653_v21 = vmul.f32 2.0, %v3150_v60 }
 0x2c1   : > { %v649_v60 = vsel %vm617_vm3, 0.0, %v3349_v5  ;;  %v655_v13 = vadd.f32 %v651_v14, %v647_v51  ;;  %v673_v14 = vsel %vm600_vm4, %v3371_v46, 0.0 }
 0x2c2   : > { %v1611_v33 = vpop.permute.xlu1 %1610  ;;  %v3519_v49 = vpop.permute.xlu0 %1606 }
 0x2c3   : > { %v1620_v57 = vsel %vm600_vm4, %v1611_v33, 0.0 }
 0x2c4   : > { %v3527_v18 = vadd.f32 %v1620_v57, %v1604_v61  ;;  %1802 = vrot.lane.b32.xlu1 %v3523_v48, %s2412_s30  ;;  %1169 = vrot.lane.b32.xlu0 %v3418_v34, %s2411_s19 }
 0x2c6   : > { %v1613_v41 = vpop.permute.xlu1 %1612  ;;  %v1385_v26 = vpop.permute.xlu0 %1384 }
 0x2c7   : > { %v1393_v38 = vsel %vm617_vm3, 0.0, %v1385_v26  ;;  %v1621_v58 = vsel %vm600_vm4, %v1613_v41, 0.0 }
 0x2c8   : > { %v1401_v6 = vadd.f32 %v1397_v50, %v1393_v38  ;;  %1824 = vrot.lane.b32.xlu1 %v3439_v3, %s2411_s19  ;;  %1756 = vrot.lane.b32.xlu0 %v1747_v44, %s2411_s19  ;;  %v650_v50 = vmul.f32 2.0, %v3138_v39  ;;  %v652_v38 = vmul.f32 2.0, %v3152_v2  ;;  %v648_v2 = vsel %vm617_vm3, 0.0, %v3367_v56  ;;  %v4139_v56 = vld [vmem:[#allocation57_spill] sm:$0xff] }
 0x2ca   : > { %v591_v16 = vpop.permute.xlu1 %590  ;;  %v1589_v1 = vpop.permute.xlu0 %1588 }
 0x2cb   : > { %v1597_v36 = vsel %vm617_vm3, 0.0, %v1589_v1  ;;  %v3577_v1 = vmul.f32 2.0, %v3196_v10  ;;  %v4136_v10 = vld [vmem:[#allocation32_spill] sm:$0xff] }
 0x2cc   : > { %v1605_v29 = vadd.f32 %v1601_v7, %v1597_v36  ;;  %1904 = vrot.lane.b32.xlu1 %v3543_v35, %s2411_s19  ;;  %1772 = vrot.lane.b32.xlu0 %v1747_v44, %s2412_s30  ;;  %v817_v7 = vmul.f32 2.0, %v3194_v9  ;;  %v3594_v36 = vadd.f32 %v4137_v17, %v4136_v10  ;;  %v656_v10 = vadd.f32 %v652_v38, %v648_v2 }
 0x2ce   : > { %v3550_v37 = vadd.f32 %v1621_v58, %v1605_v29  ;;  %v595_v43 = vpop.permute.xlu1 %594  ;;  %v1409_v24 = vpop.permute.xlu0 %1408  ;;  %v602_v29 = vsel %vm600_vm4, %v591_v16, 0.0  ;;  %v813_v16 = vsel %vm617_vm3, 0.0, %v3385_v11 }
 0x2cf   : > { %v1417_v32 = vsel %vm600_vm4, %v1409_v24, 0.0  ;;  %v4138_v24 = vld [vmem:[#allocation33_spill] sm:$0xff] }
 0x2d0   : > { %v3554_v20 = vadd.f32 %v1417_v32, %v1401_v6  ;;  %1822 = vrot.lane.b32.xlu0 %v3473_v42, %s2411_s19  ;;  %v815_v6 = vmul.f32 2.0, %v3180_v53  ;;  %v4135_v53 = vld [vmem:[#allocation55_spill] sm:$0xff]  ;;  %v3601_v4 = vadd.f32 %v4139_v56, %v4138_v24  ;;  %v675_v42 = vadd.f32 %v671_v59, %v655_v13 }
 0x2d1   : > { %v3590_v9 = vadd.f32 %v4135_v53, %v2973_v31  ;;  %v835_v31 = vsel %vm600_vm4, %v3398_v30, 0.0  ;;  %v657_v53 = vadd.f32 %v653_v21, %v649_v60  ;;  %v810_v30 = vsel %vm617_vm3, 0.0, %v3392_v22 }
 0x2d2   : > { %v608_v61 = vpop.permute.xlu1 %607  ;;  %v3558_v33 = vpop.permute.xlu0 %588  ;;  %v819_v17 = vadd.f32 %v815_v6, %v811_v63  ;;  %v604_v6 = vsel %vm600_vm4, %v595_v43, 0.0  ;;  %v683_v2 = vand.u32 2147483647, %v675_v42  ;;  %v818_v22 = vadd.f32 %v814_v0, %v810_v30 }
 0x2d3   : > { %v619_v39 = vsel %vm617_vm3, 0.0, %v608_v61  ;;  %v654_v61 = vadd.f32 %v650_v50, %v646_v52  ;;  %v837_v50 = vsel %vm600_vm4, %v3412_v45, 0.0  ;;  %v821_v52 = vadd.f32 %v817_v7, %v813_v16 }
 0x2d4   : > { %1902 = vrot.lane.b32.xlu0 %v3561_v12, %s2411_s19  ;;  %v623_v32 = vsub.f32 %v602_v29, %v619_v39  ;;  %v839_v51 = vadd.f32 %v835_v31, %v819_v17  ;;  %v677_v63 = vadd.f32 %v673_v14, %v657_v53  ;;  %v834_v45 = vsel %vm600_vm4, %v3428_v19, 0.0 }
 0x2d5   : > { %v841_v24 = vadd.f32 %v837_v50, %v821_v52  ;;  %v601_v31 = vsel %vm600_vm4, %v3558_v33, 0.0  ;;  %v672_v19 = vsel %vm600_vm4, %v3383_v28, 0.0  ;;  %v812_v53 = vsel %vm617_vm3, 0.0, %v3407_v15 }
 0x2d6   : > { %v612_v57 = vpop.permute.xlu1 %611  ;;  %v3565_v41 = vpop.permute.xlu0 %592  ;;  %v679_v23 = vand.u32 2147483647, %v623_v32  ;;  %v847_v29 = vand.u32 2147483647, %v839_v51  ;;  %v838_v17 = vadd.f32 %v834_v45, %v818_v22  ;;  %v836_v51 = vsel %vm600_vm4, %v3452_v8, 0.0 }
 0x2d7   : > { %v621_v3 = vsel %vm617_vm3, 0.0, %v612_v57  ;;  %v674_v57 = vadd.f32 %v670_v25, %v654_v61  ;;  %v685_v61 = vand.u32 2147483647, %v677_v63  ;;  %v849_v25 = vand.u32 2147483647, %v841_v24  ;;  %v4142_v24 = vld [vmem:[#allocation60_spill] sm:$0xff] }
 0x2d8   : > { %v625_v60 = vsub.f32 %v604_v6, %v621_v3  ;;  %v603_v50 = vsel %vm600_vm4, %v3565_v41, 0.0  ;;  %v820_v52 = vadd.f32 %v3577_v1, %v812_v53  ;;  %v1390_v8 = vsel %vm617_vm3, 0.0, %v3471_v27  ;;  %v4143_v27 = vld [vmem:[#allocation68_spill] sm:$0xff] }
 0x2da   : > { %v757_v26 = vpop.permute.xlu1 %756  ;;  %v606_v44 = vpop.permute.xlu0 %605  ;;  %v681_v7 = vand.u32 2147483647, %v625_v60  ;;  %v840_v45 = vadd.f32 %v836_v51, %v820_v52 }
 0x2db   : > { %v767_v39 = vsel %vm600_vm4, %v757_v26, 0.0  ;;  %v618_v59 = vsel %vm617_vm3, 0.0, %v606_v44  ;;  %v687_v26 = vadd.f32 %v683_v2, %v679_v23 }
 0x2dc   : > { %v622_v0 = vsub.f32 %v601_v31, %v618_v59  ;;  %v689_v15 = vadd.f32 %v685_v61, %v681_v7  ;;  %v4141_v59 = vld [vmem:[#allocation58_spill] sm:$0xff]  ;;  %v4145_v61 = vld [vmem:[#allocation61_spill] sm:$0xff] }
 0x2de   : > { %v761_v5 = vpop.permute.xlu1 %760  ;;  %v610_v58 = vpop.permute.xlu0 %609  ;;  %v678_v6 = vand.u32 2147483647, %v622_v0 }
 0x2df   : > { %v769_v3 = vsel %vm600_vm4, %v761_v5, 0.0  ;;  %v620_v16 = vsel %vm617_vm3, 0.0, %v610_v58  ;;  %v682_v58 = vand.u32 2147483647, %v674_v57 }
 0x2e0   : > { %v624_v60 = vsub.f32 %v603_v50, %v620_v16  ;;  %v848_v16 = vand.u32 2147483647, %v840_v45 }
 0x2e2   : > { %v773_v21 = vpop.permute.xlu1 %772  ;;  %v755_v38 = vpop.permute.xlu0 %754 }
 0x2e3   : > { %v783_v11 = vsel %vm617_vm3, 0.0, %v773_v21  ;;  %v766_v28 = vsel %vm600_vm4, %v755_v38, 0.0  ;;  %v4140_v38 = vld [vmem:[#allocation34_spill] sm:$0xff] }
 0x2e4   : > { %v787_v46 = vsub.f32 %v767_v39, %v783_v11  ;;  %v676_v11 = vadd.f32 %v672_v19, %v656_v10  ;;  %v686_v10 = vadd.f32 %v682_v58, %v678_v6  ;;  %v1598_v19 = vmul.f32 2.0, %v4145_v61 }
 0x2e6   : > { %v843_v43 = vand.u32 2147483647, %v787_v46  ;;  %v777_v56 = vpop.permute.xlu1 %776  ;;  %v759_v13 = vpop.permute.xlu0 %758  ;;  %v846_v46 = vand.u32 2147483647, %v838_v17  ;;  %v684_v0 = vand.u32 2147483647, %v676_v11 }
 0x2e7   : > { %v785_v42 = vsel %vm617_vm3, 0.0, %v777_v56  ;;  %v768_v56 = vsel %vm600_vm4, %v759_v13, 0.0 }
 0x2e8   : > { %v851_v32 = vadd.f32 %v847_v29, %v843_v43  ;;  %v789_v44 = vsub.f32 %v769_v3, %v785_v42  ;;  %v876_v29 = vadd.f32 %v4141_v59, %v4140_v38  ;;  %v1394_v43 = vmul.f32 2.0, %v4142_v24 }
 0x2e9   : > { %v1594_v3 = vsel %vm617_vm3, 0.0, %v4143_v27  ;;  %v680_v42 = vand.u32 2147483647, %v624_v60 }
 0x2ea   : > { %v855_v33 = vmax.f32 %v687_v26, %v851_v32  ;;  %v845_v14 = vand.u32 2147483647, %v789_v44  ;;  %v3631_v5 = vpop.permute.xlu1 %1336  ;;  %v771_v30 = vpop.permute.xlu0 %770  ;;  %v1398_v31 = vadd.f32 %v1394_v43, %v1390_v8  ;;  %v4144_v32 = vld [vmem:[#allocation59_spill] sm:$0xff] }
 0x2eb   : > { %v782_v21 = vsel %vm617_vm3, 0.0, %v771_v30  ;;  %v1395_v44 = vmul.f32 2.0, %v4144_v32  ;;  %v1602_v30 = vadd.f32 %v1598_v19, %v1594_v3  ;;  %v688_v6 = vadd.f32 %v684_v0, %v680_v42 }
 0x2ec   : > { %v853_v23 = vadd.f32 %v849_v25, %v845_v14  ;;  %v786_v39 = vsub.f32 %v766_v28, %v782_v21  ;;  %v879_v1 = vsub.f32 %v3590_v9, %v855_v33  ;;  %v1618_v9 = vsel %vm600_vm4, %v3519_v49, 0.0  ;;  %v4146_v33 = vld [vmem:[#allocation66_spill] sm:$0xff] }
 0x2ed   : > { %v1414_v14 = vsel %vm600_vm4, %v4146_v33, 0.0  ;;  %v4147_v28 = vld [vmem:[#allocation62_spill] sm:$0xff]  ;;  %v1347_v3 = vsel %vm600_vm4, %v3631_v5, 0.0 }
 0x2ee   : > { %v857_v2 = vmax.f32 %v689_v15, %v853_v23  ;;  %v842_v63 = vand.u32 2147483647, %v786_v39  ;;  %v1353_v41 = vpop.permute.xlu1 %1352  ;;  %v775_v22 = vpop.permute.xlu0 %774  ;;  %v883_v51 = vand.u32 2147483647, %v879_v1  ;;  %v1391_v21 = vsel %vm617_vm3, 0.0, %v4147_v28 }
 0x2ef   : > { %v784_v57 = vsel %vm617_vm3, 0.0, %v775_v22  ;;  %v1418_v15 = vadd.f32 %v1414_v14, %v1398_v31  ;;  %v1622_v39 = vadd.f32 %v1618_v9, %v1602_v30  ;;  %v1415_v31 = vsel %vm600_vm4, %v3504_v47, 0.0 }
 0x2f0   : > { %v850_v26 = vadd.f32 %v846_v46, %v842_v63  ;;  %v788_v7 = vsub.f32 %v768_v56, %v784_v57  ;;  %v881_v58 = vsub.f32 %v3601_v4, %v857_v2  ;;  %v888_v22 = vsel %vm886_vm5, %v883_v51, 0.0 }
 0x2f1   : > { %v1426_v24 = vand.u32 2147483647, %v1418_v15  ;;  %v1363_v2 = vsel %vm617_vm3, 0.0, %v1353_v41  ;;  %v1630_v57 = vand.u32 2147483647, %v1622_v39 }
 0x2f2   : > { %v854_v53 = vmax.f32 %v686_v10, %v850_v26  ;;  %v1539_v17 = vpop.permute.xlu1 %1538  ;;  %v1335_v25 = vpop.permute.xlu0 %1334  ;;  %v844_v13 = vand.u32 2147483647, %v788_v7  ;;  %v885_v27 = vand.u32 2147483647, %v881_v58  ;;  %v1399_v7 = vadd.f32 %v1395_v44, %v1391_v21 }
 0x2f3   : > { %v1550_v49 = vsel %vm600_vm4, %v1539_v17, 0.0  ;;  %v1346_v8 = vsel %vm600_vm4, %v1335_v25, 0.0  ;;  %v1367_v0 = vsub.f32 %v1347_v3, %v1363_v2  ;;  %v1631_v44 = vand.u32 2147483647, %v3498_v54 }
 0x2f4   : > { %v878_v50 = vsub.f32 %v3594_v36, %v854_v53  ;;  %v852_v23 = vadd.f32 %v848_v16, %v844_v13  ;;  %v892_v16 = vsel %vm886_vm5, %v885_v27, 0.0 }
 0x2f5   : > { %v1423_v13 = vand.u32 2147483647, %v1367_v0 }
 0x2f6   : > { %v882_v11 = vand.u32 2147483647, %v878_v50  ;;  %v1555_v52 = vpop.permute.xlu1 %1554  ;;  %v1351_v60 = vpop.permute.xlu0 %1350  ;;  %v856_v46 = vmax.f32 %v688_v6, %v852_v23 }
 0x2f7   : > { %v1566_v63 = vsel %vm617_vm3, 0.0, %v1555_v52  ;;  %v1362_v36 = vsel %vm617_vm3, 0.0, %v1351_v60 }
 0x2f8   : > { %v887_v38 = vsel %vm886_vm5, %v882_v11, 0.0  ;;  %v1570_v59 = vsub.f32 %v1550_v49, %v1566_v63  ;;  %v1366_v45 = vsub.f32 %v1346_v8, %v1362_v36  ;;  %v880_v43 = vsub.f32 %v876_v29, %v856_v46 }
 0x2f9   : > { %v889_v4 = vadd.f32 %v888_v22, %v887_v38  ;;  %v1419_v29 = vadd.f32 %v1415_v31, %v1399_v7  ;;  %v1428_v38 = vand.u32 2147483647, %v3513_v55  ;;  %v4148_v31 = vld [vmem:[#allocation18_spill] sm:$0xff] }
 0x2fa   : > { %v1626_v10 = vand.u32 2147483647, %v1570_v59  ;;  %v1422_v1 = vand.u32 2147483647, %v1366_v45  ;;  %v1355_v56 = vpop.permute.xlu1 %1354  ;;  %v1541_v26 = vpop.permute.xlu0 %1540  ;;  %v884_v42 = vand.u32 2147483647, %v880_v43 }
 0x2fb   : > { %v1551_v47 = vsel %vm600_vm4, %v1541_v26, 0.0  ;;  %v1427_v14 = vand.u32 2147483647, %v1419_v29  ;;  %v1364_v15 = vsel %vm617_vm3, 0.0, %v1355_v56  ;;  %v1632_v59 = vand.u32 2147483647, %v3527_v18 }
 0x2fc   : > { %v1634_v32 = vadd.f32 %v1630_v57, %v1626_v10  ;;  %v1430_v61 = vadd.f32 %v1426_v24, %v1422_v1  ;;  %v890_v41 = vsel %vm886_vm5, %v884_v42, 0.0  ;;  %v1864_v27 = vrot.slane %v4148_v31, 7 }
 0x2fd   : > { %v891_v19 = vadd.f32 %v890_v41, %v889_v4  ;;  %v1431_v23 = vadd.f32 %v1427_v14, %v1423_v13  ;;  %v1876_v18 = vrot.slane %v4148_v31, 1 }
 0x2fe   : > { %v1638_v53 = vmax.f32 %v1430_v61, %v1634_v32  ;;  %v1559_v17 = vpop.permute.xlu1 %1558  ;;  %v1557_v25 = vpop.permute.xlu0 %1556  ;;  %v4149_v61 = vld [vmem:[#allocation13_spill] sm:$0xff] }
 0x2ff   : > { %v1567_v9 = vsel %vm617_vm3, 0.0, %v1557_v25  ;;  %v893_v5 = vadd.f32 %v892_v16, %v891_v19  ;;  %v1568_v46 = vsel %vm617_vm3, 0.0, %v1559_v17  ;;  %v1014_v41 = vmul.f32 2.0, %v4149_v61 }
 0x300   : > { %v1571_v33 = vsub.f32 %v1551_v47, %v1567_v9  ;;  %1666 = vrot.lane.b32.xlu1 %v1638_v53, %s2410_s11  ;;  %v1633_v53 = vand.u32 2147483647, %v3550_v37  ;;  %v1429_v17 = vand.u32 2147483647, %v3554_v20 }
 0x301   : > { %v894_v30 = vsel %vm886_vm5, %v893_v5, 0.0  ;;  %v1872_v5 = vsel %vm554_vm1, 0.0, %v1864_v27  ;;  %v4156_v27 = vld [vmem:[#allocation36_spill] sm:$0xff] }
 0x302   : > { %v1627_v51 = vand.u32 2147483647, %v1571_v33  ;;  %v1357_v50 = vpop.permute.xlu1 %1356  ;;  %v1339_v28 = vpop.permute.xlu0 %1338  ;;  %v895_v21 = vrot.slane %v894_v30, 4  ;;  %v3706_v33 = vsel %vm567_vm2, %v1876_v18, 0.0 }
 0x303   : > { %v1348_v6 = vsel %vm600_vm4, %v1339_v28, 0.0  ;;  %v1365_v43 = vsel %vm617_vm3, 0.0, %v1357_v50  ;;  %v3713_v50 = vsub.f32 %v1872_v5, %v3706_v33 }
 0x304   : > { %v1635_v39 = vadd.f32 %v1631_v44, %v1627_v51  ;;  %v1368_v58 = vsub.f32 %v1348_v6, %v1364_v15  ;;  %v896_v11 = vadd.f32 %v895_v21, %v894_v30  ;;  %v4150_v21 = vld [vmem:[#allocation14_spill] sm:$0xff] }
 0x305   : > { %v1013_v15 = vmul.f32 2.0, %v4150_v21  ;;  %v4162_v21 = vld [vmem:[#allocation53_spill] sm:$0xff] }
 0x306   : > { %v1639_v49 = vmax.f32 %v1431_v23, %v1635_v39  ;;  %v1545_v52 = vpop.permute.xlu1 %1544  ;;  %v1543_v60 = vpop.permute.xlu0 %1542  ;;  %v897_v54 = vrot.slane %v896_v11, 2  ;;  %v1424_v63 = vand.u32 2147483647, %v1368_v58 }
 0x307   : > { %v1552_v8 = vsel %vm600_vm4, %v1543_v60, 0.0  ;;  %v1553_v7 = vsel %vm600_vm4, %v1545_v52, 0.0  ;;  %v4152_v60 = vld [vmem:[#allocation16_spill] sm:$0xff] }
 0x308   : > { %v1572_v36 = vsub.f32 %v1552_v8, %v1568_v46  ;;  %1668 = vrot.lane.b32.xlu0 %v1639_v49, %s2410_s11  ;;  %v898_v22 = vadd.f32 %v897_v54, %v896_v11  ;;  %v1432_v10 = vadd.f32 %v1428_v38, %v1424_v63  ;;  %v4151_v11 = vld [vmem:[#allocation64_spill] sm:$0xff]  ;;  %v1062_v54 = vrot.slane %v4152_v60, 7  ;;  %v4153_v8 = vld [vmem:[#allocation23_spill] sm:$0xff] }
 0x309   : > { %v1074_v46 = vrot.slane %v4152_v60, 1  ;;  %v4154_v38 = vld [vmem:[#allocation12_spill] sm:$0xff] }
 0x30a   : > { %v1628_v45 = vand.u32 2147483647, %v1572_v36  ;;  %v1002_v24 = vpop.permute.xlu1 %1001  ;;  %v1341_v4 = vpop.permute.xlu0 %1340  ;;  %v899_v2 = vrot.slane %v898_v22, 1 }
 0x30b   : > { %v1349_v57 = vsel %vm600_vm4, %v1341_v4, 0.0  ;;  %v1010_v0 = vsel %vm617_vm3, 0.0, %v1002_v24  ;;  %v1888_v24 = vmul.f32 2.0, %v4148_v31  ;;  %v4157_v31 = vld [vmem:[#allocation65_spill] sm:$0xff] }
 0x30c   : > { %v1636_v1 = vadd.f32 %v1632_v59, %v1628_v45  ;;  %v1369_v56 = vsub.f32 %v1349_v57, %v1365_v43  ;;  %v900_v26 = vadd.f32 %v899_v2, %v898_v22  ;;  %v1018_v25 = vadd.f32 %v1014_v41, %v1010_v0  ;;  %v4155_v57 = vld [vmem:[#allocation54_spill] sm:$0xff] }
 0x30d   : > { %v1070_v22 = vsel %vm554_vm1, 0.0, %v1062_v54  ;;  %v1717_v59 = vrot.slane %v4154_v38, 7  ;;  %v1729_v45 = vrot.slane %v4154_v38, 1  ;;  %v1741_v54 = vmul.f32 2.0, %v4154_v38 }
 0x30e   : > { %v1640_v3 = vmax.f32 %v1432_v10, %v1636_v1  ;;  %v3689_v42 = vpop.permute.xlu1 %1021  ;;  %v1561_v55 = vpop.permute.xlu0 %1560  ;;  %902 = vst.msk [vmem:[%s3695_s5] sm:$0x1] %vm901_vm6, %v900_v26  ;;  %v1425_v29 = vand.u32 2147483647, %v1369_v56  ;;  %v1007_v10 = vsel %vm617_vm3, 0.0, %v4155_v57  ;;  %v4164_v57 = vld [vmem:[#allocation49_spill] sm:$0xff] }
 0x30f   : > { %v1569_v32 = vsel %vm617_vm3, 0.0, %v1561_v55  ;;  %v1159_v55 = vmul.f32 2.0, %v4157_v31  ;;  %v980_v38 = vsel %vm617_vm3, 0.0, %v4164_v57 }
 0x310   : > { %v1573_v19 = vsub.f32 %v1553_v7, %v1569_v32  ;;  %1670 = vrot.lane.b32.xlu0 %v1640_v3, %s2410_s11  ;;  %v1433_v44 = vadd.f32 %v1429_v17, %v1425_v29  ;;  %v1011_v3 = vmul.f32 2.0, %v4156_v27  ;;  %v4158_v7 = vld [vmem:[#allocation15_spill] sm:$0xff] }
 0x312   : > { %v1629_v16 = vand.u32 2147483647, %v1573_v19  ;;  %v1026_v47 = vpop.permute.xlu1 %1025  ;;  %v1000_v9 = vpop.permute.xlu0 %999  ;;  %v1015_v32 = vadd.f32 %v1011_v3, %v1007_v10  ;;  %v1892_v19 = vadd.f32 %v1888_v24, %v1872_v5  ;;  %v4160_v5 = vld [vmem:[#allocation17_spill] sm:$0xff] }
 0x313   : > { %v1034_v13 = vsel %vm600_vm4, %v1026_v47, 0.0  ;;  %v1009_v28 = vsel %vm617_vm3, 0.0, %v1000_v9  ;;  %v3780_v47 = vsel %vm567_vm2, %v1729_v45, 0.0  ;;  %v1086_v9 = vmul.f32 2.0, %v4152_v60 }
 0x314   : > { %v1637_v14 = vadd.f32 %v1633_v53, %v1629_v16  ;;  %v3708_v30 = vadd.f32 %v1034_v13, %v1018_v25  ;;  %1918 = vrot.lane.b32.xlu0 %v3561_v12, %s2412_s30  ;;  %v1017_v6 = vadd.f32 %v1013_v15, %v1009_v28  ;;  %v4159_v53 = vld [vmem:[#allocation50_spill] sm:$0xff]  ;;  %v1725_v16 = vsel %vm554_vm1, 0.0, %v1717_v59 }
 0x315   : > { %v979_v17 = vsel %vm617_vm3, 0.0, %v4159_v53  ;;  %v1008_v15 = vsel %vm617_vm3, 0.0, %v4162_v21  ;;  %v3795_v60 = vsub.f32 %v1725_v16, %v3780_v47  ;;  %v1032_v45 = vsel %vm600_vm4, %v3689_v42, 0.0  ;;  %v4166_v21 = vld [vmem:[#allocation25_spill] sm:$0xff] }
 0x316   : > { %v1641_v37 = vmax.f32 %v1433_v44, %v1637_v14  ;;  %v1102_v20 = vpop.permute.xlu1 %1101  ;;  %v1020_v51 = vpop.permute.xlu0 %1019  ;;  %v1865_v14 = vrot.slane %v4160_v5, 7 }
 0x317   : > { %v3758_v1 = vsel %vm600_vm4, %v1102_v20, 0.0  ;;  %v1031_v0 = vsel %vm600_vm4, %v1020_v51, 0.0  ;;  %v4161_v20 = vld [vmem:[#allocation46_spill] sm:$0xff] }
 0x318   : > { %1950 = vrot.lane.b32.xlu0 %v3713_v50, %s2412_s30  ;;  %1672 = vrot.lane.b32.xlu1 %v1641_v37, %s2410_s11  ;;  %v1035_v13 = vadd.f32 %v1031_v0, %v1015_v32  ;;  %v1877_v37 = vrot.slane %v4160_v5, 1  ;;  %v963_v51 = vsel %vm600_vm4, %v4161_v20, 0.0 }
 0x319   : > { %v983_v28 = vsub.f32 %v963_v51, %v979_v17  ;;  %v4165_v17 = vld [vmem:[#allocation45_spill] sm:$0xff] }
 0x31a   : > { %v3720_v23 = vpop.permute.xlu1 %1145  ;;  %v1024_v39 = vpop.permute.xlu0 %1023  ;;  %v1043_v24 = vand.u32 2147483647, %v1035_v13 }
 0x31b   : > { %v1033_v12 = vsel %vm600_vm4, %v1024_v39, 0.0  ;;  %v1039_v27 = vand.u32 2147483647, %v983_v28  ;;  %v1156_v0 = vsel %vm617_vm3, 0.0, %v3720_v23  ;;  %v964_v23 = vsel %vm600_vm4, %v4165_v17, 0.0 }
 0x31c   : > { %v3723_v58 = vadd.f32 %v1033_v12, %v1017_v6  ;;  %1972 = vrot.lane.b32.xlu0 %v4151_v11, %s2411_s19  ;;  %1920 = vrot.lane.b32.xlu1 %v3543_v35, %s2412_s30  ;;  %v3741_v35 = vsel %vm567_vm2, %v1074_v46, 0.0  ;;  %v1896_v12 = vadd.f32 %v1892_v19, %v3706_v33  ;;  %v4163_v46 = vld [vmem:[#allocation35_spill] sm:$0xff]  ;;  %v1090_v33 = vadd.f32 %v1086_v9, %v1070_v22 }
 0x31d   : > { %v3753_v43 = vsub.f32 %v1070_v22, %v3741_v35  ;;  %v1745_v9 = vadd.f32 %v1741_v54, %v1725_v16  ;;  %v984_v13 = vsub.f32 %v964_v23, %v980_v38  ;;  %v4167_v16 = vld [vmem:[#allocation63_spill] sm:$0xff] }
 0x31e   : > { %v3729_v49 = vpop.permute.xlu1 %1800  ;;  %v1100_v52 = vpop.permute.xlu0 %1099 }
 0x31f   : > { %v1040_v54 = vand.u32 2147483647, %v984_v13 }
 0x320   : > { %1119 = vrot.lane.b32.xlu0 %v4153_v8, %s2412_s30  ;;  %1970 = vrot.lane.b32.xlu1 %v3488_v40, %s2411_s19 }
 0x322   : > { %v3737_v63 = vpop.permute.xlu1 %1948  ;;  %v1144_v36 = vpop.permute.xlu0 %1143 }
 0x323   : > { %v1155_v56 = vsel %vm617_vm3, 0.0, %v1144_v36  ;;  %v1111_v36 = vsel %vm600_vm4, %v1100_v52, 0.0  ;;  %v1885_v52 = vsel %vm567_vm2, %v1877_v37, 0.0 }
 0x324   : > { %1171 = vrot.lane.b32.xlu0 %v3508_v62, %s2411_s19  ;;  %1103 = vrot.lane.b32.xlu1 %v4153_v8, %s2411_s19  ;;  %v1163_v61 = vadd.f32 %v1159_v55, %v1155_v56  ;;  %v1012_v8 = vmul.f32 2.0, %v4163_v46  ;;  %v1873_v56 = vsel %vm554_vm1, 0.0, %v1865_v14 }
 0x325   : > { %v3831_v20 = vsub.f32 %v1873_v56, %v1885_v52 }
 0x326   : > { %v1118_v4 = vpop.permute.xlu1 %1117  ;;  %v3750_v2 = vpop.permute.xlu0 %1798  ;;  %v1016_v10 = vadd.f32 %v1012_v8, %v1008_v15 }
 0x327   : > { %v3762_v26 = vsel %vm617_vm3, 0.0, %v1118_v4 }
 0x328   : > { %v1132_v18 = vsub.f32 %v3758_v1, %v3762_v26  ;;  %1774 = vrot.lane.b32.xlu0 %v4158_v7, %s2412_s30  ;;  %1149 = vrot.lane.b32.xlu1 %v3753_v43, %s2412_s30  ;;  %v1810_v1 = vsel %vm617_vm3, 0.0, %v3750_v2 }
 0x32a   : > { %v1168_v41 = vpop.permute.xlu1 %1167  ;;  %v3773_v29 = vpop.permute.xlu0 %1946  ;;  %v1188_v46 = vand.u32 2147483647, %v1132_v18 }
 0x32b   : > { %v1179_v25 = vsel %vm600_vm4, %v1168_v41, 0.0  ;;  %v1160_v41 = vmul.f32 2.0, %v3418_v34 }
 0x32c   : > { %v1183_v44 = vadd.f32 %v1179_v25, %v1163_v61  ;;  %1826 = vrot.lane.b32.xlu0 %v3523_v48, %s2411_s19  ;;  %1758 = vrot.lane.b32.xlu1 %v4158_v7, %s2411_s19  ;;  %v1036_v7 = vadd.f32 %v1032_v45, %v1016_v10  ;;  %v1047_v61 = vadd.f32 %v1043_v24, %v1039_v27 }
 0x32d   : > { %v1094_v25 = vadd.f32 %v1090_v33, %v3741_v35  ;;  %v1889_v35 = vmul.f32 2.0, %v4160_v5  ;;  %v1749_v45 = vadd.f32 %v1745_v9, %v3780_v47  ;;  %v4168_v47 = vld [vmem:[#allocation67_spill] sm:$0xff] }
 0x32e   : > { %v1755_v6 = vpop.permute.xlu1 %1754  ;;  %v1116_v39 = vpop.permute.xlu0 %1115  ;;  %v1191_v3 = vand.u32 2147483647, %v1183_v44  ;;  %v1164_v44 = vadd.f32 %v1160_v41, %v1156_v0  ;;  %v1044_v28 = vand.u32 2147483647, %v1036_v7  ;;  %v1814_v27 = vmul.f32 2.0, %v4168_v47 }
 0x32f   : > { %v1127_v59 = vsel %vm617_vm3, 0.0, %v1116_v39  ;;  %v3815_v22 = vsel %vm600_vm4, %v1755_v6, 0.0  ;;  %v1815_v39 = vmul.f32 2.0, %v4167_v16  ;;  %v4173_v16 = vld [vmem:[#allocation37_spill] sm:$0xff] }
 0x330   : > { %v1131_v4 = vsub.f32 %v1111_v36, %v1127_v59  ;;  %1922 = vrot.lane.b32.xlu0 %v1896_v12, %s2412_s30  ;;  %1804 = vrot.lane.b32.xlu1 %v3795_v60, %s2412_s30  ;;  %v1818_v0 = vadd.f32 %v1814_v27, %v1810_v1  ;;  %v4176_v1 = vld [vmem:[#allocation43_spill] sm:$0xff] }
 0x332   : > { %v1187_v31 = vand.u32 2147483647, %v1131_v4  ;;  %v1771_v42 = vpop.permute.xlu1 %1770  ;;  %v3810_v55 = vpop.permute.xlu0 %1147  ;;  %v1048_v4 = vadd.f32 %v1044_v28, %v1040_v54  ;;  %v4171_v28 = vld [vmem:[#allocation38_spill] sm:$0xff] }
 0x333   : > { %v3818_v32 = vsel %vm617_vm3, 0.0, %v1771_v42 }
 0x334   : > { %v1195_v19 = vadd.f32 %v1191_v3, %v1187_v31  ;;  %v1786_v53 = vsub.f32 %v3815_v22, %v3818_v32  ;;  %1974 = vrot.lane.b32.xlu0 %v3713_v50, %s2411_s19  ;;  %1906 = vrot.lane.b32.xlu1 %v1896_v12, %s2411_s19  ;;  %v1811_v12 = vsel %vm617_vm3, 0.0, %v3729_v49  ;;  %v1893_v49 = vadd.f32 %v1889_v35, %v1873_v56  ;;  %v4169_v31 = vld [vmem:[#allocation24_spill] sm:$0xff]  ;;  %v4172_v35 = vld [vmem:[#allocation41_spill] sm:$0xff] }
 0x335   : > { %v1819_v33 = vadd.f32 %v1815_v39, %v1811_v12  ;;  %v1659_v39 = vsub.f32 %v4173_v16, %v4172_v35  ;;  %v1157_v16 = vsel %vm617_vm3, 0.0, %v3810_v55 }
 0x336   : > { %v1199_v14 = vmax.f32 %v1047_v61, %v1195_v19  ;;  %v3829_v37 = vpop.permute.xlu1 %1802  ;;  %v1170_v34 = vpop.permute.xlu0 %1169  ;;  %v1897_v56 = vadd.f32 %v1893_v49, %v1885_v52  ;;  %v1842_v52 = vand.u32 2147483647, %v1786_v53 }
 0x337   : > { %v1180_v51 = vsel %vm600_vm4, %v1170_v34, 0.0 }
 0x338   : > { %v1207_v15 = vsub.f32 %v4166_v21, %v1199_v14  ;;  %v1184_v6 = vadd.f32 %v1180_v51, %v1164_v44  ;;  %1121 = vrot.lane.b32.xlu0 %v1094_v25, %s2412_s30  ;;  %1952 = vrot.lane.b32.xlu1 %v3831_v20, %s2412_s30  ;;  %v4170_v51 = vld [vmem:[#allocation42_spill] sm:$0xff] }
 0x339   : > { %v1658_v21 = vsub.f32 %v4171_v28, %v4170_v51 }
 0x33a   : > { %v1192_v8 = vand.u32 2147483647, %v1184_v6  ;;  %v1825_v36 = vpop.permute.xlu1 %1824  ;;  %v1757_v59 = vpop.permute.xlu0 %1756  ;;  %v1211_v3 = vand.u32 2147483647, %v1207_v15 }
 0x33b   : > { %v1835_v24 = vsel %vm600_vm4, %v1825_v36, 0.0  ;;  %v1767_v26 = vsel %vm600_vm4, %v1757_v59, 0.0 }
 0x33c   : > { %v1196_v5 = vadd.f32 %v1192_v8, %v1188_v46  ;;  %1760 = vrot.lane.b32.xlu0 %v1749_v45, %s2411_s19  ;;  %1105 = vrot.lane.b32.xlu1 %v1094_v25, %s2411_s19  ;;  %v1839_v38 = vadd.f32 %v1835_v24, %v1819_v33  ;;  %v1215_v19 = vsel %vm886_vm5, %v1211_v3, 0.0  ;;  %v4175_v24 = vld [vmem:[#allocation40_spill] sm:$0xff]  ;;  %v1959_v3 = vsel %vm617_vm3, 0.0, %v3737_v63 }
 0x33e   : > { %v1200_v57 = vmax.f32 %v1048_v4, %v1196_v5  ;;  %v1773_v10 = vpop.permute.xlu0 %1772  ;;  %v1847_v2 = vand.u32 2147483647, %v1839_v38  ;;  %v1905_v14 = vpop.permute.xlu1 %1904 }
 0x33f   : > { %v1783_v18 = vsel %vm617_vm3, 0.0, %v1773_v10 }
 0x340   : > { %v1208_v42 = vsub.f32 %v4169_v31, %v1200_v57  ;;  %v1787_v7 = vsub.f32 %v1767_v26, %v1783_v18  ;;  %1828 = vrot.lane.b32.xlu0 %v3795_v60, %s2411_s19  ;;  %1173 = vrot.lane.b32.xlu1 %v3753_v43, %s2411_s19  ;;  %v4177_v26 = vld [vmem:[#allocation39_spill] sm:$0xff] }
 0x341   : > { %v1661_v18 = vsub.f32 %v4177_v26, %v4176_v1  ;;  %v4180_v1 = vld [vmem:[#allocation21_spill] sm:$0xff]  ;;  %v4181_v26 = vld [vmem:[#allocation19_spill] sm:$0xff] }
 0x342   : > { %v1212_v22 = vand.u32 2147483647, %v1208_v42  ;;  %v1843_v32 = vand.u32 2147483647, %v1787_v7  ;;  %v1823_v61 = vpop.permute.xlu0 %1822  ;;  %v1963_v42 = vmul.f32 2.0, %v4151_v11 }
 0x343   : > { %v1834_v41 = vsel %vm600_vm4, %v1823_v61, 0.0 }
 0x344   : > { %v1216_v17 = vsel %vm886_vm5, %v1212_v22, 0.0  ;;  %v3862_v23 = vadd.f32 %v1847_v2, %v1843_v32  ;;  %v1838_v25 = vadd.f32 %v1834_v41, %v1818_v0  ;;  %1924 = vrot.lane.b32.xlu0 %v1897_v56, %s2412_s30  ;;  %1776 = vrot.lane.b32.xlu1 %v1749_v45, %s2412_s30  ;;  %v4174_v45 = vld [vmem:[#allocation44_spill] sm:$0xff]  ;;  %v1962_v0 = vmul.f32 2.0, %v3488_v40 }
 0x345   : > { %v3866_v9 = vadd.f32 %v1216_v17, %v1215_v19  ;;  %v1660_v4 = vsub.f32 %v4175_v24, %v4174_v45  ;;  %v1958_v22 = vsel %vm617_vm3, 0.0, %v3773_v29  ;;  %v1915_v2 = vsel %vm600_vm4, %v1905_v14, 0.0 }
 0x346   : > { %v1846_v13 = vand.u32 2147483647, %v1838_v25  ;;  %v1903_v15 = vpop.permute.xlu0 %1902 }
 0x347   : > { %v1914_v29 = vsel %vm600_vm4, %v1903_v15, 0.0 }
 0x348   : > { %v3868_v44 = vadd.f32 %v1846_v13, %v1842_v52  ;;  %1908 = vrot.lane.b32.xlu1 %v1897_v56, %s2411_s19  ;;  %v1967_v56 = vadd.f32 %v1963_v42, %v1959_v3  ;;  %v4178_v13 = vld [vmem:[#allocation52_spill] sm:$0xff] }
 0x349   : > { %v981_v40 = vsel %vm617_vm3, 0.0, %v4178_v13 }
 0x34c   : > { %1976 = vrot.lane.b32.xlu1 %v3831_v20, %s2411_s19 }
 0x372   : > { %v1667_v34 = vpop.permute.xlu1 %1666 }
 0x373   : > { %v1678_v6 = vsub.f32 %v1658_v21, %v1667_v34  ;;  %v1966_v34 = vadd.f32 %v1962_v0, %v1958_v22 }
 0x375   : > { %v1682_v53 = vand.u32 2147483647, %v1678_v6 }
 0x377   : > { %v1687_v8 = vsel %vm1686_vm7, %v1682_v53, 0.0  ;;  %v4179_v53 = vld [vmem:[#allocation48_spill] sm:$0xff] }
 0x37a   : > { %v1669_v12 = vpop.permute.xlu0 %1668 }
 0x37b   : > { %v1679_v54 = vsub.f32 %v1659_v39, %v1669_v12 }
 0x37d   : > { %v1683_v46 = vand.u32 2147483647, %v1679_v54  ;;  %v965_v54 = vsel %vm600_vm4, %v4179_v53, 0.0 }
 0x37f   : > { %v1688_v36 = vsel %vm1686_vm7, %v1683_v46, 0.0  ;;  %v1161_v46 = vmul.f32 2.0, %v3508_v62 }
 0x380   : > { %v1689_v59 = vadd.f32 %v1688_v36, %v1687_v8  ;;  %v985_v36 = vsub.f32 %v965_v54, %v981_v40 }
 0x381   : > { %v1165_v24 = vadd.f32 %v1161_v46, %v1157_v16 }
 0x382   : > { %v1671_v33 = vpop.permute.xlu0 %1670 }
 0x383   : > { %v1680_v5 = vsub.f32 %v1660_v4, %v1671_v33 }
 0x385   : > { %v1684_v49 = vand.u32 2147483647, %v1680_v5 }
 0x386   : > { %v1919_v57 = vpop.permute.xlu0 %1918 }
 0x387   : > { %v1690_v38 = vsel %vm1686_vm7, %v1684_v49, 0.0  ;;  %v1930_v41 = vsel %vm617_vm3, 0.0, %v1919_v57 }
 0x388   : > { %v1691_v10 = vadd.f32 %v1690_v38, %v1689_v59  ;;  %v1934_v14 = vsub.f32 %v1914_v29, %v1930_v41  ;;  %v1045_v59 = vand.u32 2147483647, %v3723_v58 }
 0x38a   : > { %v1673_v47 = vpop.permute.xlu1 %1672  ;;  %v3884_v27 = vpop.permute.xlu0 %1950  ;;  %v1990_v4 = vand.u32 2147483647, %v1934_v14  ;;  %v1816_v14 = vmul.f32 2.0, %v3523_v48 }
 0x38b   : > { %v1681_v31 = vsub.f32 %v1661_v18, %v1673_v47  ;;  %v4182_v18 = vsub.f32 %v4180_v1, %v4181_v26 }
 0x38d   : > { %v1685_v7 = vand.u32 2147483647, %v1681_v31 }
 0x38e   : > { %v1921_v32 = vpop.permute.xlu1 %1920  ;;  %v1973_v61 = vpop.permute.xlu0 %1972 }
 0x38f   : > { %v1692_v19 = vsel %vm1686_vm7, %v1685_v7, 0.0  ;;  %v1931_v63 = vsel %vm617_vm3, 0.0, %v1921_v32  ;;  %v1983_v17 = vsel %vm600_vm4, %v1973_v61, 0.0  ;;  %v1041_v7 = vand.u32 2147483647, %v985_v36 }
 0x390   : > { %v1693_v11 = vadd.f32 %v1692_v19, %v1691_v10  ;;  %v1935_v25 = vsub.f32 %v1915_v2, %v1931_v63  ;;  %v1987_v52 = vadd.f32 %v1983_v17, %v1967_v56  ;;  %v4183_v19 = vld [vmem:[#allocation22_spill] sm:$0xff]  ;;  %v4184_v63 = vld [vmem:[#allocation20_spill] sm:$0xff] }
 0x391   : > { %v1049_v61 = vadd.f32 %v1045_v59, %v1041_v7  ;;  %v4185_v17 = vsub.f32 %v4183_v19, %v4184_v63 }
 0x392   : > { %v1694_v51 = vsel %vm1686_vm7, %v1693_v11, 0.0  ;;  %v1991_v28 = vand.u32 2147483647, %v1935_v25  ;;  %v1995_v21 = vand.u32 2147483647, %v1987_v52  ;;  %v1971_v6 = vpop.permute.xlu1 %1970  ;;  %v1120_v35 = vpop.permute.xlu0 %1119 }
 0x393   : > { %v1695_v39 = vrot.slane %v1694_v51, 4  ;;  %v1982_v12 = vsel %vm600_vm4, %v1971_v6, 0.0  ;;  %v1129_v38 = vsel %vm617_vm3, 0.0, %v1120_v35 }
 0x394   : > { %v1999_v8 = vadd.f32 %v1995_v21, %v1991_v28  ;;  %v1986_v15 = vadd.f32 %v1982_v12, %v1966_v34  ;;  %v4186_v21 = vld [vmem:[#allocation31_spill] sm:$0xff] }
 0x395   : > { %v1696_v45 = vadd.f32 %v1695_v39, %v1694_v51 }
 0x396   : > { %v2003_v33 = vmax.f32 %v3862_v23, %v1999_v8  ;;  %v1994_v5 = vand.u32 2147483647, %v1986_v15  ;;  %v1104_v55 = vpop.permute.xlu1 %1103  ;;  %v1172_v49 = vpop.permute.xlu0 %1171  ;;  %v1964_v8 = vmul.f32 2.0, %v3713_v50 }
 0x397   : > { %v1697_v57 = vrot.slane %v1696_v45, 2  ;;  %v1113_v10 = vsel %vm600_vm4, %v1104_v55, 0.0  ;;  %v1181_v62 = vsel %vm600_vm4, %v1172_v49, 0.0 }
 0x398   : > { %v2011_v47 = vsub.f32 %v4182_v18, %v2003_v33  ;;  %v1998_v58 = vadd.f32 %v1994_v5, %v1990_v4  ;;  %v1133_v3 = vsub.f32 %v1113_v10, %v1129_v38  ;;  %v1185_v31 = vadd.f32 %v1181_v62, %v1165_v24 }
 0x399   : > { %v1698_v42 = vadd.f32 %v1697_v57, %v1696_v45 }
 0x39a   : > { %v2002_v23 = vmax.f32 %v3868_v44, %v1998_v58  ;;  %v1189_v56 = vand.u32 2147483647, %v1133_v3  ;;  %v1193_v0 = vand.u32 2147483647, %v1185_v31  ;;  %v1150_v22 = vpop.permute.xlu1 %1149  ;;  %v1775_v2 = vpop.permute.xlu0 %1774  ;;  %v2015_v41 = vand.u32 2147483647, %v2011_v47 }
 0x39b   : > { %v1699_v32 = vrot.slane %v1698_v42, 1  ;;  %v1812_v44 = vsel %vm617_vm3, 0.0, %v3829_v37  ;;  %v1960_v37 = vsel %vm617_vm3, 0.0, %v3884_v27  ;;  %v1784_v48 = vsel %vm617_vm3, 0.0, %v1775_v2  ;;  %v4187_v31 = vld [vmem:[#allocation51_spill] sm:$0xff] }
 0x39c   : > { %v2010_v11 = vsub.f32 %v4185_v17, %v2002_v23  ;;  %v1197_v25 = vadd.f32 %v1193_v0, %v1189_v56  ;;  %v2019_v51 = vsel %vm886_vm5, %v2015_v41, 0.0  ;;  %v1820_v12 = vadd.f32 %v1816_v14, %v1812_v44  ;;  %v4188_v0 = vld [vmem:[#allocation29_spill] sm:$0xff]  ;;  %v4189_v2 = vld [vmem:[#allocation27_spill] sm:$0xff] }
 0x39d   : > { %v1700_v52 = vadd.f32 %v1699_v32, %v1698_v42  ;;  %v1968_v24 = vadd.f32 %v1964_v8, %v1960_v37  ;;  %v982_v42 = vsel %vm617_vm3, 0.0, %v4187_v31  ;;  %v1158_v7 = vsel %vm617_vm3, 0.0, %v1150_v22  ;;  %v4191_v41 = vld [vmem:[#allocation47_spill] sm:$0xff] }
 0x39e   : > { %v2014_v13 = vand.u32 2147483647, %v2010_v11  ;;  %v1201_v40 = vmax.f32 %v1049_v61, %v1197_v25  ;;  %v1759_v34 = vpop.permute.xlu1 %1758  ;;  %v1827_v29 = vpop.permute.xlu0 %1826  ;;  %v1162_v56 = vmul.f32 2.0, %v3753_v43  ;;  %v4190_v32 = vsub.f32 %v4188_v0, %v4189_v2 }
 0x39f   : > { %1702 = vrot.lane.b32.xlu0 %v1700_v52, %s2409_s4  ;;  %v1768_v16 = vsel %vm600_vm4, %v1759_v34, 0.0  ;;  %v1836_v39 = vsel %vm600_vm4, %v1827_v29, 0.0  ;;  %v966_v19 = vsel %vm600_vm4, %v4191_v41, 0.0 }
 0x3a0   : > { %v2018_v28 = vsel %vm886_vm5, %v2014_v13, 0.0  ;;  %v1209_v6 = vsub.f32 %v4186_v21, %v1201_v40  ;;  %v1788_v36 = vsub.f32 %v1768_v16, %v1784_v48  ;;  %v1840_v59 = vadd.f32 %v1836_v39, %v1820_v12 }
 0x3a1   : > { %v2020_v35 = vadd.f32 %v2019_v51, %v2018_v28  ;;  %v986_v17 = vsub.f32 %v966_v19, %v982_v42  ;;  %v1166_v11 = vadd.f32 %v1162_v56, %v1158_v7  ;;  %v1046_v40 = vand.u32 2147483647, %v3708_v30  ;;  %v4193_v7 = vld [vmem:[#allocation28_spill] sm:$0xff] }
 0x3a2   : > { %v1213_v53 = vand.u32 2147483647, %v1209_v6  ;;  %v1805_v54 = vpop.permute.xlu1 %1804  ;;  %v1923_v46 = vpop.permute.xlu0 %1922  ;;  %v1844_v49 = vand.u32 2147483647, %v1788_v36  ;;  %v1848_v57 = vand.u32 2147483647, %v1840_v59 }
 0x3a3   : > { %v1932_v5 = vsel %vm617_vm3, 0.0, %v1923_v46  ;;  %v1042_v14 = vand.u32 2147483647, %v986_v17  ;;  %v1813_v39 = vsel %vm617_vm3, 0.0, %v1805_v54  ;;  %v1965_v59 = vmul.f32 2.0, %v3831_v20 }
 0x3a4   : > { %v1218_v15 = vsel %vm886_vm5, %v1213_v53, 0.0  ;;  %v1852_v18 = vadd.f32 %v1848_v57, %v1844_v49  ;;  %v1817_v53 = vmul.f32 2.0, %v3795_v60 }
 0x3a5   : > { %v3934_v45 = vadd.f32 %v1218_v15, %v3866_v9  ;;  %v1050_v6 = vadd.f32 %v1046_v40, %v1042_v14 }
 0x3a6   : > { %v1907_v4 = vpop.permute.xlu1 %1906  ;;  %v1975_v33 = vpop.permute.xlu0 %1974  ;;  %v1821_v36 = vadd.f32 %v1817_v53, %v1813_v39 }
 0x3a7   : > { %v1916_v55 = vsel %vm600_vm4, %v1907_v4, 0.0  ;;  %v1984_v27 = vsel %vm600_vm4, %v1975_v33, 0.0 }
 0x3a8   : > { %v1936_v38 = vsub.f32 %v1916_v55, %v1932_v5  ;;  %v1988_v50 = vadd.f32 %v1984_v27, %v1968_v24  ;;  %v4192_v24 = vld [vmem:[#allocation30_spill] sm:$0xff] }
 0x3aa   : > { %v1992_v10 = vand.u32 2147483647, %v1936_v38  ;;  %v1996_v62 = vand.u32 2147483647, %v1988_v50  ;;  %v1953_v1 = vpop.permute.xlu1 %1952  ;;  %v1122_v26 = vpop.permute.xlu0 %1121 }
 0x3ab   : > { %v1130_v63 = vsel %vm617_vm3, 0.0, %v1122_v26  ;;  %v1961_v48 = vsel %vm617_vm3, 0.0, %v1953_v1 }
 0x3ac   : > { %v2000_v9 = vadd.f32 %v1996_v62, %v1992_v10  ;;  %v1969_v60 = vadd.f32 %v1965_v59, %v1961_v48 }
 0x3ae   : > { %v2004_v47 = vmax.f32 %v1852_v18, %v2000_v9  ;;  %v1106_v58 = vpop.permute.xlu1 %1105  ;;  %v1761_v3 = vpop.permute.xlu0 %1760 }
 0x3af   : > { %v1114_v23 = vsel %vm600_vm4, %v1106_v58, 0.0  ;;  %v1769_v8 = vsel %vm600_vm4, %v1761_v3, 0.0 }
 0x3b0   : > { %v2012_v61 = vsub.f32 %v4190_v32, %v2004_v47  ;;  %v1134_v52 = vsub.f32 %v1114_v23, %v1130_v63  ;;  %v4194_v23 = vld [vmem:[#allocation26_spill] sm:$0xff] }
 0x3b1   : > { %v4195_v56 = vsub.f32 %v4193_v7, %v4194_v23 }
 0x3b2   : > { %v2016_v25 = vand.u32 2147483647, %v2012_v61  ;;  %v1174_v13 = vpop.permute.xlu1 %1173  ;;  %v1829_v29 = vpop.permute.xlu0 %1828  ;;  %v1190_v51 = vand.u32 2147483647, %v1134_v52 }
 0x3b3   : > { %v1182_v22 = vsel %vm600_vm4, %v1174_v13, 0.0 }
 0x3b4   : > { %v2021_v43 = vsel %vm886_vm5, %v2016_v25, 0.0  ;;  %v1186_v34 = vadd.f32 %v1182_v22, %v1166_v11 }
 0x3b5   : > { %v2022_v44 = vadd.f32 %v2021_v43, %v2020_v35  ;;  %v1837_v35 = vsel %vm600_vm4, %v1829_v29, 0.0 }
 0x3b6   : > { %v1194_v28 = vand.u32 2147483647, %v1186_v34  ;;  %v1777_v21 = vpop.permute.xlu1 %1776  ;;  %v1925_v37 = vpop.permute.xlu0 %1924  ;;  %v1841_v55 = vadd.f32 %v1837_v35, %v1821_v36 }
 0x3b7   : > { %v1785_v12 = vsel %vm617_vm3, 0.0, %v1777_v21  ;;  %v1933_v33 = vsel %vm617_vm3, 0.0, %v1925_v37 }
 0x3b8   : > { %v1198_v16 = vadd.f32 %v1194_v28, %v1190_v51  ;;  %v1789_v4 = vsub.f32 %v1769_v8, %v1785_v12  ;;  %v1849_v1 = vand.u32 2147483647, %v1841_v55 }
 0x3ba   : > { %v1202_v46 = vmax.f32 %v1050_v6, %v1198_v16  ;;  %v1909_v30 = vpop.permute.xlu1 %1908  ;;  %v1845_v50 = vand.u32 2147483647, %v1789_v4 }
 0x3bb   : > { %v1917_v15 = vsel %vm600_vm4, %v1909_v30, 0.0 }
 0x3bc   : > { %v1210_v54 = vsub.f32 %v4192_v24, %v1202_v46  ;;  %v1937_v27 = vsub.f32 %v1917_v15, %v1933_v33  ;;  %v1853_v47 = vadd.f32 %v1849_v1, %v1845_v50 }
 0x3be   : > { %v1214_v5 = vand.u32 2147483647, %v1210_v54  ;;  %v1977_v49 = vpop.permute.xlu1 %1976  ;;  %v1993_v20 = vand.u32 2147483647, %v1937_v27 }
 0x3bf   : > { %v1985_v57 = vsel %vm600_vm4, %v1977_v49, 0.0 }
 0x3c0   : > { %v1220_v38 = vsel %vm886_vm5, %v1214_v5, 0.0  ;;  %v1989_v10 = vadd.f32 %v1985_v57, %v1969_v60 }
 0x3c1   : > { %v1221_v62 = vadd.f32 %v1220_v38, %v3934_v45 }
 0x3c2   : > { %v1997_v26 = vand.u32 2147483647, %v1989_v10 }
 0x3c3   : > { %v1222_v18 = vsel %vm886_vm5, %v1221_v62, 0.0 }
 0x3c4   : > { %v1223_v9 = vrot.slane %v1222_v18, 4  ;;  %v2001_v58 = vadd.f32 %v1997_v26, %v1993_v20 }
 0x3c6   : > { %v1224_v3 = vadd.f32 %v1223_v9, %v1222_v18  ;;  %v2005_v31 = vmax.f32 %v1853_v47, %v2001_v58 }
 0x3c8   : > { %v1225_v42 = vrot.slane %v1224_v3, 2  ;;  %v2013_v0 = vsub.f32 %v4195_v56, %v2005_v31 }
 0x3ca   : > { %v1226_v2 = vadd.f32 %v1225_v42, %v1224_v3  ;;  %v2017_v45 = vand.u32 2147483647, %v2013_v0 }
 0x3cc   : > { %v1227_v32 = vrot.slane %v1226_v2, 1  ;;  %v2023_v61 = vsel %vm886_vm5, %v2017_v45, 0.0 }
 0x3cd   : > { %v2024_v41 = vadd.f32 %v2023_v61, %v2022_v44 }
 0x3ce   : > { %v1228_v19 = vadd.f32 %v1227_v32, %v1226_v2 }
 0x3cf   : > { %v2025_v63 = vsel %vm886_vm5, %v2024_v41, 0.0 }
 0x3d0   : > { %v2026_v17 = vrot.slane %v2025_v63, 4  ;;  %1229 = vst.msk [vmem:[%s3695_s5 + $0x1] sm:$0x1] %vm901_vm6, %v1228_v19 }
 0x3d2   : > { %v2027_v11 = vadd.f32 %v2026_v17, %v2025_v63 }
 0x3d4   : > { %v2028_v25 = vrot.slane %v2027_v11, 2 }
 0x3d6   : > { %v2029_v52 = vadd.f32 %v2028_v25, %v2027_v11 }
 0x3d8   : > { %v2030_v13 = vrot.slane %v2029_v52, 1 }
 0x3da   : > { %v2031_v22 = vadd.f32 %v2030_v13, %v2029_v52 }
 0x3dc   : > { %2032 = vst.msk [vmem:[%s3695_s5 + $0x3] sm:$0x1] %vm901_vm6, %v2031_v22 }
 0x411   : > { %v1703_v40 = vpop.permute.xlu0 %1702 }
 0x412   : > { %1705 = vst.msk [vmem:[%s3695_s5 + $0x2] sm:$0x1] %vm901_vm6, %v1703_v40 }
 0x413   : > { %2345 = shalt.err (!%p2342_p6)
}
 0x414   : > { %s2346_s9 = scalar_lea.hbm %s3981_s1, 64  ;;  %s2350_s22 = scalar_lea.hbm %s4023_s3, 128 }
 0x415   : > { %p2347_p12 = scmp.ne.s32.totalorder %s3981_s1, %s2346_s9  ;;  %p2351_p4 = scmp.lt.s32.totalorder %s3981_s1, %s4023_s3 }
 0x416   : > { %p2352_p2 = scmp.lt.s32.totalorder %s2350_s22, %s2346_s9 }
 0x417   : > { %p2348_p0 = pnand %p2347_p12, %p4196_p7 }
 0x418   : > { %p2353_p5 = por %p2352_p2, %p2351_p4 }
 0x419   : > { %p2349_p11 = pneg %p2348_p0 }
 0x41b   : > { %p2354_p13 = pnand %p2353_p5, %p2349_p11 }
 0x41d   : > { %2357 = shalt.err (!%p2354_p13)
}
 0x41e   : > { %2190 = dma.vmem_to_hbm [thread:$0]  (%p4196_p7), %s2048_s27, 64, %s3981_s1, %s2034_s10  }
 0x41f PF: > { %s2059_s11 = sand.u32 1, %s2388_s12   ;;  %p4197_p8 = scmp.ne.s32.totalorder %s4067_s24, 0 }
 0x420   : > { %p4198_p10 = scmp.ge.s32.totalorder %s2400_s15, 2  ;;  %s2060_s19 = scalar_lea.sflag [#allocation4], %s2059_s11 }
 0x422   : > { %p2203_p1 = pnand %p4198_p10, %p4197_p8 }
 0x424   : > { %p2204_p3 = pneg %p2203_p1 }
 0x426   : > { %2383 = dma.done.wait (%p2204_p3), %s2060_s19, 64  }
 0x427   : > { %2385 = vsyncadd (%p2204_p3), %s2060_s19, 4294967232  ;;  %p19_p9 = scmp.ge.s32.totalorder %s2459_s18, 4   ;;  %s4199_s12 = smov %s2392_s13 }
 0x428   : > { %s4200_s13 = smov %s2396_s14  ;;  %s4201_s14 = smov %s2471_s21 }
 0x429   : > { %s4202_s15 = smov %s2459_s18  ;;  %21 = sbr.rel (!%p19_p9) target bundleno = 10 (0xa), region = 101 }
 0x42e   :  { %2065 = vsyncpa [#allocation3], 1 }
 0x42f   :  { %2067 = vsyncpa [#allocation3 + $0x1], 1 }
 0x430   :  { %2068 = vsyncpa [#allocation6], 1 }
 0x431   :  { %2070 = vsyncpa [#allocation6 + $0x1], 1 }
 0x432   :  { %2071 = vsyncpa [#allocation4], 1 }
 0x433   :  { %2073 = vsyncpa [#allocation4 + $0x1], 1 }

</bundles_post_ra>
